<compile_context>
chip_gen: v7x
topology: tpu7x:2x2x1
jax: 0.10.0
libtpu: 0.0.40
codegen_flags: <defaults>
</compile_context>

<pallas_src>
import functools

import jax
import jax.numpy as jnp
from jax import lax
from jax.experimental import pallas as pl
from jax.experimental.pallas import tpu as pltpu


def _fullspec(shape):
    n = len(shape)
    return pl.BlockSpec(shape, lambda i, _n=n: (0,) * _n)


def _round_up(n, m):
    return ((n + m - 1) // m) * m


# ---------------------------------------------------------------------------
# Shared bidirectional-LSTM recurrence (packed-sequence semantics).
# Fills hf_ref / hb_ref scratch (R, H) with the per-direction hidden states.
# ---------------------------------------------------------------------------
def _bilstm_into_scratch(x, valid_ref,
                         wih_f_ref, whh_f_ref, b_f_ref,
                         wih_b_ref, whh_b_ref, b_b_ref,
                         xwf_ref, xwb_ref, hf_ref, hb_ref,
                         *, T, BP, H):
    x_bf = x.astype(jnp.bfloat16)
    # Hoisted input-to-hidden projections (+ bias): one MXU matmul per direction.
    xwf_ref[...] = (jnp.dot(x_bf, wih_f_ref[...].astype(jnp.bfloat16),
                            preferred_element_type=jnp.float32) + b_f_ref[...])
    xwb_ref[...] = (jnp.dot(x_bf, wih_b_ref[...].astype(jnp.bfloat16),
                            preferred_element_type=jnp.float32) + b_b_ref[...])

    whh_f = whh_f_ref[...].astype(jnp.bfloat16)
    whh_b = whh_b_ref[...].astype(jnp.bfloat16)

    def gates_to_hc(g, c):
        # TODO(synk): gate slices are not 128-lane aligned for small H; at realistic
        # sizes (H=256) they are naturally aligned, so no relayout on the serial path.
        i_g = jax.nn.sigmoid(g[:, 0:H])
        f_g = jax.nn.sigmoid(g[:, H:2 * H])
        g_g = jnp.tanh(g[:, 2 * H:3 * H])
        o_g = jax.nn.sigmoid(g[:, 3 * H:4 * H])
        c_new = f_g * c + i_g * g_g
        h_new = o_g * jnp.tanh(c_new)
        return h_new, c_new

    zeros = jnp.zeros((BP, H), jnp.float32)

    def body(i, carry):
        hf, cf, hb, cb = carry
        rf = pl.multiple_of(i * BP, BP)                # forward timestep rows
        rb = pl.multiple_of((T - 1 - i) * BP, BP)      # backward timestep rows
        # --- forward direction ---
        gf = xwf_ref[pl.ds(rf, BP), :] + jnp.dot(
            hf.astype(jnp.bfloat16), whh_f, preferred_element_type=jnp.float32)
        hf_n, cf_n = gates_to_hc(gf, cf)
        vf = valid_ref[pl.ds(rf, BP), :]               # (BP, 1): 0 past sequence length
        hf_n = hf_n * vf
        cf_n = cf_n * vf
        hf_ref[pl.ds(rf, BP), :] = hf_n
        # --- backward direction (independent; co-issues with forward) ---
        gb = xwb_ref[pl.ds(rb, BP), :] + jnp.dot(
            hb.astype(jnp.bfloat16), whh_b, preferred_element_type=jnp.float32)
        hb_n, cb_n = gates_to_hc(gb, cb)
        vb = valid_ref[pl.ds(rb, BP), :]
        hb_n = hb_n * vb
        cb_n = cb_n * vb
        hb_ref[pl.ds(rb, BP), :] = hb_n
        return (hf_n, cf_n, hb_n, cb_n)

    lax.fori_loop(0, T, body, (zeros, zeros, zeros, zeros))


# ---------------------------------------------------------------------------
# Fused encoder layer: BiLSTM -> AdaLayerNorm -> cat(style) -> masked_fill
# ---------------------------------------------------------------------------
def _enc_layer_kernel(x_ref, s_ref, valid_ref,
                      wih_f_ref, whh_f_ref, b_f_ref,
                      wih_b_ref, whh_b_ref, b_b_ref,
                      aw_ref, ab_ref,
                      out_ref,
                      xwf_ref, xwb_ref, hf_ref, hb_ref,
                      *, T, BP, H, eps):
    x = x_ref[...]
    _bilstm_into_scratch(x, valid_ref,
                         wih_f_ref, whh_f_ref, b_f_ref,
                         wih_b_ref, whh_b_ref, b_b_ref,
                         xwf_ref, xwb_ref, hf_ref, hb_ref, T=T, BP=BP, H=H)
    d_model = 2 * H
    y = jnp.concatenate([hf_ref[...], hb_ref[...]], axis=-1)      # (R, d_model)
    # TODO(synk): F.dropout(p=0.1) after the LSTM is a no-op at inference.
    s = s_ref[...]
    mod = (jnp.dot(s.astype(jnp.bfloat16), aw_ref[...].astype(jnp.bfloat16),
                   preferred_element_type=jnp.float32) + ab_ref[...])   # (R, 2*d_model)
    gamma = mod[:, 0:d_model]
    beta = mod[:, d_model:2 * d_model]
    mean = jnp.mean(y, axis=-1, keepdims=True)
    var = jnp.mean(jnp.square(y - mean), axis=-1, keepdims=True)  # biased, like F.layer_norm
    yn = (y - mean) * lax.rsqrt(var + eps)
    yo = (1.0 + gamma) * yn + beta
    # Fused epilogue: cat style + masked_fill, written once (single HBM pass).
    out_ref[...] = jnp.concatenate([yo, s], axis=-1) * valid_ref[...]


# ---------------------------------------------------------------------------
# Fused predictor head: BiLSTM -> duration projection (lane-padded) + en bmm
# ---------------------------------------------------------------------------
def _head_kernel(x_ref, valid_ref, align_ref,
                 wih_f_ref, whh_f_ref, b_f_ref,
                 wih_b_ref, whh_b_ref, b_b_ref,
                 pw_ref, pb_ref,
                 dur_ref, en_ref,
                 xwf_ref, xwb_ref, hf_ref, hb_ref,
                 *, T, BP, NB, H):
    x = x_ref[...]
    _bilstm_into_scratch(x, valid_ref,
                         wih_f_ref, whh_f_ref, b_f_ref,
                         wih_b_ref, whh_b_ref, b_b_ref,
                         xwf_ref, xwb_ref, hf_ref, hb_ref, T=T, BP=BP, H=H)
    y = jnp.concatenate([hf_ref[...], hb_ref[...]], axis=-1)      # (R, 2H)
    # TODO(synk): F.dropout(p=0.5) before the projection is a no-op at inference.
    dur_ref[...] = (jnp.dot(y.astype(jnp.bfloat16), pw_ref[...].astype(jnp.bfloat16),
                            preferred_element_type=jnp.float32) + pb_ref[...])
    # en = d^T @ alignment, computed in-kernel so d^T is never materialized in HBM.
    for b in range(NB):  # NB is tiny & static; each iteration is one MXU matmul
        db = x_ref[pl.ds(b, T, stride=BP), :]                     # rows of batch b -> (T, Cin)
        en_ref[b] = jnp.dot(db.T, align_ref[b], preferred_element_type=jnp.float32)


# ---------------------------------------------------------------------------
# pallas_call wrappers
# ---------------------------------------------------------------------------
def _enc_layer(x, s, valid, layer, *, T, BP):
    R, _ = x.shape
    S = s.shape[-1]
    p = layer["lstm"]
    H = p["whh_f"].shape[0]
    d_model = 2 * H
    args = (x, s, valid, p["wih_f"], p["whh_f"], p["b_f"],
            p["wih_b"], p["whh_b"], p["b_b"], layer["aln_w"], layer["aln_b"])
    return pl.pallas_call(
        functools.partial(_enc_layer_kernel, T=T, BP=BP, H=H, eps=1e-5),
        grid=(1,),
        in_specs=[_fullspec(a.shape) for a in args],
        out_specs=_fullspec((R, d_model + S)),
        out_shape=jax.ShapeDtypeStruct((R, d_model + S), jnp.float32),
        scratch_shapes=[pltpu.VMEM((R, 4 * H), jnp.float32),
                        pltpu.VMEM((R, 4 * H), jnp.float32),
                        pltpu.VMEM((R, H), jnp.float32),
                        pltpu.VMEM((R, H), jnp.float32)],
        compiler_params=pltpu.CompilerParams(dimension_semantics=("arbitrary",)),
    )(*args)


def _head(d, valid, alignment, lstm_p, proj_w, proj_b, *, T, BP):
    R, Cin = d.shape
    NB, _, frames = alignment.shape
    H = lstm_p["whh_f"].shape[0]
    Mpad = proj_w.shape[-1]
    args = (d, valid, alignment, lstm_p["wih_f"], lstm_p["whh_f"], lstm_p["b_f"],
            lstm_p["wih_b"], lstm_p["whh_b"], lstm_p["b_b"], proj_w, proj_b)
    return pl.pallas_call(
        functools.partial(_head_kernel, T=T, BP=BP, NB=NB, H=H),
        grid=(1,),
        in_specs=[_fullspec(a.shape) for a in args],
        out_specs=(_fullspec((R, Mpad)), _fullspec((NB, Cin, frames))),
        out_shape=(jax.ShapeDtypeStruct((R, Mpad), jnp.float32),
                   jax.ShapeDtypeStruct((NB, Cin, frames), jnp.float32)),
        scratch_shapes=[pltpu.VMEM((R, 4 * H), jnp.float32),
                        pltpu.VMEM((R, 4 * H), jnp.float32),
                        pltpu.VMEM((R, H), jnp.float32),
                        pltpu.VMEM((R, H), jnp.float32)],
        compiler_params=pltpu.CompilerParams(dimension_semantics=("arbitrary",)),
    )(*args)


# ---------------------------------------------------------------------------
# Parameters (deterministic synthetic init; shapes follow the PyTorch __init__)
# ---------------------------------------------------------------------------
def init_params(key, style_dim, d_hid, nlayers, max_dur):
    H = d_hid // 2
    cin = d_hid + style_dim
    sc = 1.0 / (H ** 0.5)
    keys = list(jax.random.split(key, 8 * (nlayers + 1) + nlayers + 1))
    it = iter(keys)

    def u(shape):
        return jax.random.uniform(next(it), shape, jnp.float32, -sc, sc)

    def lstm_params():
        # weights stored pre-transposed: wih (Cin, 4H), whh (H, 4H); bias = b_ih + b_hh
        return dict(
            wih_f=u((cin, 4 * H)), whh_f=u((H, 4 * H)), b_f=u((1, 4 * H)) + u((1, 4 * H)),
            wih_b=u((cin, 4 * H)), whh_b=u((H, 4 * H)), b_b=u((1, 4 * H)) + u((1, 4 * H)),
        )

    encoder = []
    for _ in range(nlayers):
        layer = dict(lstm=lstm_params())
        layer["aln_w"] = jax.random.normal(next(it), (style_dim, 2 * d_hid), jnp.float32) * 0.1
        layer["aln_b"] = jnp.zeros((1, 2 * d_hid), jnp.float32)
        encoder.append(layer)

    top_lstm = lstm_params()
    proj_w = jax.random.normal(next(it), (d_hid, max_dur), jnp.float32) * 0.1
    proj_b = jnp.zeros((1, max_dur), jnp.float32)
    return dict(encoder=encoder, top_lstm=top_lstm, proj_w=proj_w, proj_b=proj_b)


# ---------------------------------------------------------------------------
# Full forward (JAX glue orchestrating the fused Pallas kernels)
# ---------------------------------------------------------------------------
def duration_predictor_forward(params, texts, style, text_lengths, alignment, mask):
    # texts: (B, d_hid, T) NCL; style: (B, style_dim, T) NCL; alignment: (B, T, frames)
    # mask: (B, T) bool (True = padded); mask == (t >= text_lengths[b]) by contract,
    # so the same validity mask drives both masked_fill and packed-sequence behaviour.
    B, d_hid, T = texts.shape
    S = style.shape[1]
    BP = _round_up(B, 8)            # pad batch to a sublane multiple (rows per timestep)
    R = T * BP
    max_dur = params["proj_w"].shape[-1]

    def _flatten_tm(a_nclike):      # (B, C, T) -> (T*BP, C), row = t*BP + b
        a = jnp.transpose(a_nclike, (2, 0, 1)).astype(jnp.float32)        # (T, B, C)
        a = jnp.pad(a, ((0, 0), (0, BP - B), (0, 0)))                     # (T, BP, C)
        return a.reshape(R, a.shape[-1])

    x = _flatten_tm(texts)                                                # (R, d_hid)
    s = _flatten_tm(style)                                                # (R, S)
    valid = jnp.transpose(jnp.logical_not(mask)).astype(jnp.float32)      # (T, B)
    valid = jnp.pad(valid, ((0, 0), (0, BP - B))).reshape(R, 1)           # 0 for pad rows

    # DurationEncoder input: cat([x, style], channel) + masked_fill
    x = jnp.concatenate([x, s], axis=-1) * valid                          # (R, d_hid + S)
    for layer in params["encoder"]:
        x = _enc_layer(x, s, valid, layer, T=T, BP=BP)                    # fused layer
    d = x                                                                 # (R, d_hid + S)

    # DurationPredictor head: top BiLSTM + duration projection + en bmm (fused).
    Mpad = _round_up(max_dur, 64)                                         # lane-dense stores
    pw = jnp.pad(params["proj_w"], ((0, 0), (0, Mpad - max_dur)))
    pb = jnp.pad(params["proj_b"], ((0, 0), (0, Mpad - max_dur)))
    dur2d, en = _head(d, valid, alignment, params["top_lstm"], pw, pb, T=T, BP=BP)

    duration = jnp.transpose(dur2d.reshape(T, BP, Mpad), (1, 0, 2))[:B, :, :max_dur]
    return duration, en   # duration.squeeze(-1) is a no-op since max_dur > 1


if __name__ == "__main__":
    B, T, d_hid, style_dim, nlayers, max_dur, frames = 2, 8, 32, 16, 2, 50, 12

    key = jax.random.PRNGKey(0)
    k1, k2, k3, kp = jax.random.split(key, 4)
    texts = jax.random.normal(k1, (B, d_hid, T), jnp.float32)
    style = jax.random.normal(k2, (B, style_dim, T), jnp.float32)
    alignment = jax.random.normal(k3, (B, T, frames), jnp.float32)
    text_lengths = jnp.array([T, 5], dtype=jnp.int32)
    mask = jnp.arange(T)[None, :] >= text_lengths[:, None]     # True = padded

    params = init_params(kp, style_dim, d_hid, nlayers, max_dur)

    fwd = jax.jit(duration_predictor_forward)
    duration, en = fwd(params, texts, style, text_lengths, alignment, mask)
    jax.block_until_ready((duration, en))

    assert duration.shape == (B, T, max_dur)
    assert en.shape == (B, d_hid + style_dim, frames)
    print("KERNEL_OK")
</pallas_src>

<mosaic_0001>
module attributes {stable_mosaic.version = 11 : i64} {
  func.func @_enc_layer_kernel(%arg0: i32, %arg1: memref<64x48xf32, #tpu.memory_space<vmem>>, %arg2: memref<64x16xf32, #tpu.memory_space<vmem>>, %arg3: memref<64x1xf32, #tpu.memory_space<vmem>>, %arg4: memref<48x64xf32, #tpu.memory_space<vmem>>, %arg5: memref<16x64xf32, #tpu.memory_space<vmem>>, %arg6: memref<1x64xf32, #tpu.memory_space<vmem>>, %arg7: memref<48x64xf32, #tpu.memory_space<vmem>>, %arg8: memref<16x64xf32, #tpu.memory_space<vmem>>, %arg9: memref<1x64xf32, #tpu.memory_space<vmem>>, %arg10: memref<16x64xf32, #tpu.memory_space<vmem>>, %arg11: memref<1x64xf32, #tpu.memory_space<vmem>>, %arg12: memref<64x48xf32, #tpu.memory_space<vmem>>, %arg13: memref<64x64xf32, #tpu.memory_space<vmem>>, %arg14: memref<64x64xf32, #tpu.memory_space<vmem>>, %arg15: memref<64x16xf32, #tpu.memory_space<vmem>>, %arg16: memref<64x16xf32, #tpu.memory_space<vmem>>) attributes {dimension_semantics = [#tpu.dimension_semantics<arbitrary>], iteration_bounds = array<i64: 1>, scalar_prefetch = 0 : i64, scratch_operands = 4 : i64, tpu.core_type = #tpu.core_type<tc>, window_params = [{pipeline_mode = #tpu.pipeline_mode<synchronous>, transform_indices = @transform_0, window_bounds = array<i64: 64, 48>}, {pipeline_mode = #tpu.pipeline_mode<synchronous>, transform_indices = @transform_1, window_bounds = array<i64: 64, 16>}, {pipeline_mode = #tpu.pipeline_mode<synchronous>, transform_indices = @transform_2, window_bounds = array<i64: 64, 1>}, {pipeline_mode = #tpu.pipeline_mode<synchronous>, transform_indices = @transform_3, window_bounds = array<i64: 48, 64>}, {pipeline_mode = #tpu.pipeline_mode<synchronous>, transform_indices = @transform_4, window_bounds = array<i64: 16, 64>}, {pipeline_mode = #tpu.pipeline_mode<synchronous>, transform_indices = @transform_5, window_bounds = array<i64: 1, 64>}, {pipeline_mode = #tpu.pipeline_mode<synchronous>, transform_indices = @transform_6, window_bounds = array<i64: 48, 64>}, {pipeline_mode = #tpu.pipeline_mode<synchronous>, transform_indices = @transform_7, window_bounds = array<i64: 16, 64>}, {pipeline_mode = #tpu.pipeline_mode<synchronous>, transform_indices = @transform_8, window_bounds = array<i64: 1, 64>}, {pipeline_mode = #tpu.pipeline_mode<synchronous>, transform_indices = @transform_9, window_bounds = array<i64: 16, 64>}, {pipeline_mode = #tpu.pipeline_mode<synchronous>, transform_indices = @transform_10, window_bounds = array<i64: 1, 64>}, {pipeline_mode = #tpu.pipeline_mode<synchronous>, transform_indices = @transform_11, window_bounds = array<i64: 64, 48>}]} {
    %c0 = arith.constant 0 : index
    %c0_0 = arith.constant 0 : index
    %0 = vector.load %arg1[%c0, %c0_0] : memref<64x48xf32, #tpu.memory_space<vmem>>, vector<64x48xf32>
    %1 = arith.truncf %0 : vector<64x48xf32> to vector<64x48xbf16>
    %c0_1 = arith.constant 0 : index
    %c0_2 = arith.constant 0 : index
    %2 = vector.load %arg4[%c0_1, %c0_2] : memref<48x64xf32, #tpu.memory_space<vmem>>, vector<48x64xf32>
    %3 = arith.truncf %2 : vector<48x64xf32> to vector<48x64xbf16>
    %cst = arith.constant dense<0.000000e+00> : vector<64x64xf32>
    %4 = tpu.matmul %1, %3, %cst {dimension_numbers = #tpu.dot_dimension_numbers<[1], [0], [0], [1], [0, 0, 1, 1], [], []>} : vector<64x48xbf16>, vector<48x64xbf16>, vector<64x64xf32> -> vector<64x64xf32>
    %c0_3 = arith.constant 0 : index
    %c0_4 = arith.constant 0 : index
    %5 = vector.load %arg6[%c0_3, %c0_4] : memref<1x64xf32, #tpu.memory_space<vmem>>, vector<1x64xf32>
    %6 = vector.broadcast %5 : vector<1x64xf32> to vector<64x64xf32>
    %7 = arith.addf %4, %6 : vector<64x64xf32>
    %c0_5 = arith.constant 0 : index
    %c0_6 = arith.constant 0 : index
    %8 = vector.load %arg13[%c0_5, %c0_6] : memref<64x64xf32, #tpu.memory_space<vmem>>, vector<64x64xf32>
    tpu.vector_store %arg13[%c0_5, %c0_6], %7 {strides = array<i32>} : memref<64x64xf32, #tpu.memory_space<vmem>>, vector<64x64xf32>,
    %c0_7 = arith.constant 0 : index
    %c0_8 = arith.constant 0 : index
    %9 = vector.load %arg7[%c0_7, %c0_8] : memref<48x64xf32, #tpu.memory_space<vmem>>, vector<48x64xf32>
    %10 = arith.truncf %9 : vector<48x64xf32> to vector<48x64xbf16>
    %cst_9 = arith.constant dense<0.000000e+00> : vector<64x64xf32>
    %11 = tpu.matmul %1, %10, %cst_9 {dimension_numbers = #tpu.dot_dimension_numbers<[1], [0], [0], [1], [0, 0, 1, 1], [], []>} : vector<64x48xbf16>, vector<48x64xbf16>, vector<64x64xf32> -> vector<64x64xf32>
    %c0_10 = arith.constant 0 : index
    %c0_11 = arith.constant 0 : index
    %12 = vector.load %arg9[%c0_10, %c0_11] : memref<1x64xf32, #tpu.memory_space<vmem>>, vector<1x64xf32>
    %13 = vector.broadcast %12 : vector<1x64xf32> to vector<64x64xf32>
    %14 = arith.addf %11, %13 : vector<64x64xf32>
    %c0_12 = arith.constant 0 : index
    %c0_13 = arith.constant 0 : index
    %15 = vector.load %arg14[%c0_12, %c0_13] : memref<64x64xf32, #tpu.memory_space<vmem>>, vector<64x64xf32>
    tpu.vector_store %arg14[%c0_12, %c0_13], %14 {strides = array<i32>} : memref<64x64xf32, #tpu.memory_space<vmem>>, vector<64x64xf32>,
    %c0_14 = arith.constant 0 : index
    %c0_15 = arith.constant 0 : index
    %16 = vector.load %arg5[%c0_14, %c0_15] : memref<16x64xf32, #tpu.memory_space<vmem>>, vector<16x64xf32>
    %17 = arith.truncf %16 : vector<16x64xf32> to vector<16x64xbf16>
    %c0_16 = arith.constant 0 : index
    %c0_17 = arith.constant 0 : index
    %18 = vector.load %arg8[%c0_16, %c0_17] : memref<16x64xf32, #tpu.memory_space<vmem>>, vector<16x64xf32>
    %19 = arith.truncf %18 : vector<16x64xf32> to vector<16x64xbf16>
    %cst_18 = arith.constant 0.000000e+00 : f32
    %20 = vector.broadcast %cst_18 : f32 to vector<8x16xf32>
    %c0_i32 = arith.constant 0 : i32
    %c8_i32 = arith.constant 8 : i32
    %21 = arith.addi %c0_i32, %c8_i32 : i32
    %c1_i32 = arith.constant 1 : i32
    %22:4 = scf.for %arg17 = %c0_i32 to %21 step %c1_i32 iter_args(%arg18 = %20, %arg19 = %20, %arg20 = %20, %arg21 = %20) -> (vector<8x16xf32>, vector<8x16xf32>, vector<8x16xf32>, vector<8x16xf32>)  : i32 {
      %c8_i32_41 = arith.constant 8 : i32
      %63 = arith.muli %arg17, %c8_i32_41 : i32
      %64 = tpu.assume_multiple %63, 8 : i32
      %c7_i32 = arith.constant 7 : i32
      %65 = arith.subi %c7_i32, %arg17 : i32
      %c8_i32_42 = arith.constant 8 : i32
      %66 = arith.muli %65, %c8_i32_42 : i32
      %67 = tpu.assume_multiple %66, 8 : i32
      %68 = arith.index_cast %64 : i32 to index
      %c0_43 = arith.constant 0 : index
      %69 = vector.load %arg13[%68, %c0_43] : memref<64x64xf32, #tpu.memory_space<vmem>>, vector<8x64xf32>
      %70 = arith.truncf %arg18 : vector<8x16xf32> to vector<8x16xbf16>
      %cst_44 = arith.constant dense<0.000000e+00> : vector<8x64xf32>
      %71 = tpu.matmul %70, %17, %cst_44 {dimension_numbers = #tpu.dot_dimension_numbers<[1], [0], [0], [1], [0, 0, 1, 1], [], []>} : vector<8x16xbf16>, vector<16x64xbf16>, vector<8x64xf32> -> vector<8x64xf32>
      %72 = arith.addf %69, %71 : vector<8x64xf32>
      %73 = vector.extract_strided_slice %72 {offsets = [0, 0], sizes = [8, 16], strides = [1, 1]} : vector<8x64xf32> to vector<8x16xf32>
      %74 = arith.negf %73 : vector<8x16xf32>
      %75 = math.exp %74 : vector<8x16xf32>
      %cst_45 = arith.constant 1.000000e+00 : f32
      %76 = vector.broadcast %cst_45 : f32 to vector<8x16xf32>
      %77 = arith.addf %76, %75 : vector<8x16xf32>
      %78 = arith.divf %76, %77 : vector<8x16xf32>
      %79 = vector.extract_strided_slice %72 {offsets = [0, 16], sizes = [8, 16], strides = [1, 1]} : vector<8x64xf32> to vector<8x16xf32>
      %80 = arith.negf %79 : vector<8x16xf32>
      %81 = math.exp %80 : vector<8x16xf32>
      %cst_46 = arith.constant 1.000000e+00 : f32
      %82 = vector.broadcast %cst_46 : f32 to vector<8x16xf32>
      %83 = arith.addf %82, %81 : vector<8x16xf32>
      %84 = arith.divf %82, %83 : vector<8x16xf32>
      %85 = vector.extract_strided_slice %72 {offsets = [0, 32], sizes = [8, 16], strides = [1, 1]} : vector<8x64xf32> to vector<8x16xf32>
      %86 = math.tanh %85 : vector<8x16xf32>
      %87 = vector.extract_strided_slice %72 {offsets = [0, 48], sizes = [8, 16], strides = [1, 1]} : vector<8x64xf32> to vector<8x16xf32>
      %88 = arith.negf %87 : vector<8x16xf32>
      %89 = math.exp %88 : vector<8x16xf32>
      %cst_47 = arith.constant 1.000000e+00 : f32
      %90 = vector.broadcast %cst_47 : f32 to vector<8x16xf32>
      %91 = arith.addf %90, %89 : vector<8x16xf32>
      %92 = arith.divf %90, %91 : vector<8x16xf32>
      %93 = arith.mulf %84, %arg19 : vector<8x16xf32>
      %94 = arith.mulf %78, %86 : vector<8x16xf32>
      %95 = arith.addf %93, %94 : vector<8x16xf32>
      %96 = math.tanh %95 : vector<8x16xf32>
      %97 = arith.mulf %92, %96 : vector<8x16xf32>
      %98 = arith.index_cast %64 : i32 to index
      %c0_48 = arith.constant 0 : index
      %99 = vector.load %arg3[%98, %c0_48] : memref<64x1xf32, #tpu.memory_space<vmem>>, vector<8x1xf32>
      %100 = vector.broadcast %99 : vector<8x1xf32> to vector<8x16xf32>
      %101 = arith.mulf %97, %100 : vector<8x16xf32>
      %102 = vector.broadcast %99 : vector<8x1xf32> to vector<8x16xf32>
      %103 = arith.mulf %95, %102 : vector<8x16xf32>
      %104 = arith.index_cast %64 : i32 to index
      %c0_49 = arith.constant 0 : index
      %105 = vector.load %arg15[%104, %c0_49] : memref<64x16xf32, #tpu.memory_space<vmem>>, vector<8x16xf32>
      tpu.vector_store %arg15[%104, %c0_49], %101 {strides = array<i32>} : memref<64x16xf32, #tpu.memory_space<vmem>>, vector<8x16xf32>,
      %106 = arith.index_cast %67 : i32 to index
      %c0_50 = arith.constant 0 : index
      %107 = vector.load %arg14[%106, %c0_50] : memref<64x64xf32, #tpu.memory_space<vmem>>, vector<8x64xf32>
      %108 = arith.truncf %arg20 : vector<8x16xf32> to vector<8x16xbf16>
      %cst_51 = arith.constant dense<0.000000e+00> : vector<8x64xf32>
      %109 = tpu.matmul %108, %19, %cst_51 {dimension_numbers = #tpu.dot_dimension_numbers<[1], [0], [0], [1], [0, 0, 1, 1], [], []>} : vector<8x16xbf16>, vector<16x64xbf16>, vector<8x64xf32> -> vector<8x64xf32>
      %110 = arith.addf %107, %109 : vector<8x64xf32>
      %111 = vector.extract_strided_slice %110 {offsets = [0, 0], sizes = [8, 16], strides = [1, 1]} : vector<8x64xf32> to vector<8x16xf32>
      %112 = arith.negf %111 : vector<8x16xf32>
      %113 = math.exp %112 : vector<8x16xf32>
      %cst_52 = arith.constant 1.000000e+00 : f32
      %114 = vector.broadcast %cst_52 : f32 to vector<8x16xf32>
      %115 = arith.addf %114, %113 : vector<8x16xf32>
      %116 = arith.divf %114, %115 : vector<8x16xf32>
      %117 = vector.extract_strided_slice %110 {offsets = [0, 16], sizes = [8, 16], strides = [1, 1]} : vector<8x64xf32> to vector<8x16xf32>
      %118 = arith.negf %117 : vector<8x16xf32>
      %119 = math.exp %118 : vector<8x16xf32>
      %cst_53 = arith.constant 1.000000e+00 : f32
      %120 = vector.broadcast %cst_53 : f32 to vector<8x16xf32>
      %121 = arith.addf %120, %119 : vector<8x16xf32>
      %122 = arith.divf %120, %121 : vector<8x16xf32>
      %123 = vector.extract_strided_slice %110 {offsets = [0, 32], sizes = [8, 16], strides = [1, 1]} : vector<8x64xf32> to vector<8x16xf32>
      %124 = math.tanh %123 : vector<8x16xf32>
      %125 = vector.extract_strided_slice %110 {offsets = [0, 48], sizes = [8, 16], strides = [1, 1]} : vector<8x64xf32> to vector<8x16xf32>
      %126 = arith.negf %125 : vector<8x16xf32>
      %127 = math.exp %126 : vector<8x16xf32>
      %cst_54 = arith.constant 1.000000e+00 : f32
      %128 = vector.broadcast %cst_54 : f32 to vector<8x16xf32>
      %129 = arith.addf %128, %127 : vector<8x16xf32>
      %130 = arith.divf %128, %129 : vector<8x16xf32>
      %131 = arith.mulf %122, %arg21 : vector<8x16xf32>
      %132 = arith.mulf %116, %124 : vector<8x16xf32>
      %133 = arith.addf %131, %132 : vector<8x16xf32>
      %134 = math.tanh %133 : vector<8x16xf32>
      %135 = arith.mulf %130, %134 : vector<8x16xf32>
      %136 = arith.index_cast %67 : i32 to index
      %c0_55 = arith.constant 0 : index
      %137 = vector.load %arg3[%136, %c0_55] : memref<64x1xf32, #tpu.memory_space<vmem>>, vector<8x1xf32>
      %138 = vector.broadcast %137 : vector<8x1xf32> to vector<8x16xf32>
      %139 = arith.mulf %135, %138 : vector<8x16xf32>
      %140 = vector.broadcast %137 : vector<8x1xf32> to vector<8x16xf32>
      %141 = arith.mulf %133, %140 : vector<8x16xf32>
      %142 = arith.index_cast %67 : i32 to index
      %c0_56 = arith.constant 0 : index
      %143 = vector.load %arg16[%142, %c0_56] : memref<64x16xf32, #tpu.memory_space<vmem>>, vector<8x16xf32>
      tpu.vector_store %arg16[%142, %c0_56], %139 {strides = array<i32>} : memref<64x16xf32, #tpu.memory_space<vmem>>, vector<8x16xf32>,
      scf.yield %101, %103, %139, %141 : vector<8x16xf32>, vector<8x16xf32>, vector<8x16xf32>, vector<8x16xf32>
    }
    %c8_i32_19 = arith.constant 8 : i32
    %c0_20 = arith.constant 0 : index
    %c0_21 = arith.constant 0 : index
    %23 = vector.load %arg15[%c0_20, %c0_21] : memref<64x16xf32, #tpu.memory_space<vmem>>, vector<64x16xf32>
    %c0_22 = arith.constant 0 : index
    %c0_23 = arith.constant 0 : index
    %24 = vector.load %arg16[%c0_22, %c0_23] : memref<64x16xf32, #tpu.memory_space<vmem>>, vector<64x16xf32>
    %25 = tpu.concatenate %23, %24 in 1 : vector<64x16xf32>, vector<64x16xf32> -> vector<64x32xf32>
    %c0_24 = arith.constant 0 : index
    %c0_25 = arith.constant 0 : index
    %26 = vector.load %arg2[%c0_24, %c0_25] : memref<64x16xf32, #tpu.memory_space<vmem>>, vector<64x16xf32>
    %27 = arith.truncf %26 : vector<64x16xf32> to vector<64x16xbf16>
    %c0_26 = arith.constant 0 : index
    %c0_27 = arith.constant 0 : index
    %28 = vector.load %arg10[%c0_26, %c0_27] : memref<16x64xf32, #tpu.memory_space<vmem>>, vector<16x64xf32>
    %29 = arith.truncf %28 : vector<16x64xf32> to vector<16x64xbf16>
    %cst_28 = arith.constant dense<0.000000e+00> : vector<64x64xf32>
    %30 = tpu.matmul %27, %29, %cst_28 {dimension_numbers = #tpu.dot_dimension_numbers<[1], [0], [0], [1], [0, 0, 1, 1], [], []>} : vector<64x16xbf16>, vector<16x64xbf16>, vector<64x64xf32> -> vector<64x64xf32>
    %c0_29 = arith.constant 0 : index
    %c0_30 = arith.constant 0 : index
    %31 = vector.load %arg11[%c0_29, %c0_30] : memref<1x64xf32, #tpu.memory_space<vmem>>, vector<1x64xf32>
    %32 = vector.broadcast %31 : vector<1x64xf32> to vector<64x64xf32>
    %33 = arith.addf %30, %32 : vector<64x64xf32>
    %34 = vector.extract_strided_slice %33 {offsets = [0, 0], sizes = [64, 32], strides = [1, 1]} : vector<64x64xf32> to vector<64x32xf32>
    %35 = vector.extract_strided_slice %33 {offsets = [0, 32], sizes = [64, 32], strides = [1, 1]} : vector<64x64xf32> to vector<64x32xf32>
    %cst_31 = arith.constant dense<0.000000e+00> : vector<64xf32>
    %36 = vector.multi_reduction <add>, %25, %cst_31 [1] : vector<64x32xf32> to vector<64xf32>
    %37 = vector.shape_cast %36 : vector<64xf32> to vector<64x1xf32>
    %cst_32 = arith.constant 3.200000e+01 : f32
    %38 = vector.broadcast %cst_32 : f32 to vector<64x1xf32>
    %39 = arith.divf %37, %38 : vector<64x1xf32>
    %40 = vector.broadcast %39 : vector<64x1xf32> to vector<64x32xf32>
    %41 = arith.subf %25, %40 : vector<64x32xf32>
    %42 = arith.mulf %41, %41 : vector<64x32xf32>
    %cst_33 = arith.constant dense<0.000000e+00> : vector<64xf32>
    %43 = vector.multi_reduction <add>, %42, %cst_33 [1] : vector<64x32xf32> to vector<64xf32>
    %44 = vector.shape_cast %43 : vector<64xf32> to vector<64x1xf32>
    %cst_34 = arith.constant 3.200000e+01 : f32
    %45 = vector.broadcast %cst_34 : f32 to vector<64x1xf32>
    %46 = arith.divf %44, %45 : vector<64x1xf32>
    %47 = vector.broadcast %39 : vector<64x1xf32> to vector<64x32xf32>
    %48 = arith.subf %25, %47 : vector<64x32xf32>
    %cst_35 = arith.constant 9.99999974E-6 : f32
    %49 = vector.broadcast %cst_35 : f32 to vector<64x1xf32>
    %50 = arith.addf %46, %49 : vector<64x1xf32>
    %51 = math.rsqrt %50 : vector<64x1xf32>
    %52 = vector.broadcast %51 : vector<64x1xf32> to vector<64x32xf32>
    %53 = arith.mulf %48, %52 : vector<64x32xf32>
    %cst_36 = arith.constant 1.000000e+00 : f32
    %54 = vector.broadcast %cst_36 : f32 to vector<64x32xf32>
    %55 = arith.addf %54, %34 : vector<64x32xf32>
    %56 = arith.mulf %55, %53 : vector<64x32xf32>
    %57 = arith.addf %56, %35 : vector<64x32xf32>
    %58 = tpu.concatenate %57, %26 in 1 : vector<64x32xf32>, vector<64x16xf32> -> vector<64x48xf32>
    %c0_37 = arith.constant 0 : index
    %c0_38 = arith.constant 0 : index
    %59 = vector.load %arg3[%c0_37, %c0_38] : memref<64x1xf32, #tpu.memory_space<vmem>>, vector<64x1xf32>
    %60 = vector.broadcast %59 : vector<64x1xf32> to vector<64x48xf32>
    %61 = arith.mulf %58, %60 : vector<64x48xf32>
    %c0_39 = arith.constant 0 : index
    %c0_40 = arith.constant 0 : index
    %62 = vector.load %arg12[%c0_39, %c0_40] : memref<64x48xf32, #tpu.memory_space<vmem>>, vector<64x48xf32>
    tpu.vector_store %arg12[%c0_39, %c0_40], %61 {strides = array<i32>} : memref<64x48xf32, #tpu.memory_space<vmem>>, vector<64x48xf32>,
    return
  }
  func.func @transform_0(%arg0: i32) -> (i32, i32) {
    %c0_i32 = arith.constant 0 : i32
    %c0_i32_0 = arith.constant 0 : i32
    %c0_i32_1 = arith.constant 0 : i32
    return %c0_i32, %c0_i32_0 : i32, i32
  }
  func.func @transform_1(%arg0: i32) -> (i32, i32) {
    %c0_i32 = arith.constant 0 : i32
    %c0_i32_0 = arith.constant 0 : i32
    %c0_i32_1 = arith.constant 0 : i32
    return %c0_i32, %c0_i32_0 : i32, i32
  }
  func.func @transform_2(%arg0: i32) -> (i32, i32) {
    %c0_i32 = arith.constant 0 : i32
    %c0_i32_0 = arith.constant 0 : i32
    %c0_i32_1 = arith.constant 0 : i32
    return %c0_i32, %c0_i32_0 : i32, i32
  }
  func.func @transform_3(%arg0: i32) -> (i32, i32) {
    %c0_i32 = arith.constant 0 : i32
    %c0_i32_0 = arith.constant 0 : i32
    %c0_i32_1 = arith.constant 0 : i32
    return %c0_i32, %c0_i32_0 : i32, i32
  }
  func.func @transform_4(%arg0: i32) -> (i32, i32) {
    %c0_i32 = arith.constant 0 : i32
    %c0_i32_0 = arith.constant 0 : i32
    %c0_i32_1 = arith.constant 0 : i32
    return %c0_i32, %c0_i32_0 : i32, i32
  }
  func.func @transform_5(%arg0: i32) -> (i32, i32) {
    %c0_i32 = arith.constant 0 : i32
    %c0_i32_0 = arith.constant 0 : i32
    %c0_i32_1 = arith.constant 0 : i32
    return %c0_i32, %c0_i32_0 : i32, i32
  }
  func.func @transform_6(%arg0: i32) -> (i32, i32) {
    %c0_i32 = arith.constant 0 : i32
    %c0_i32_0 = arith.constant 0 : i32
    %c0_i32_1 = arith.constant 0 : i32
    return %c0_i32, %c0_i32_0 : i32, i32
  }
  func.func @transform_7(%arg0: i32) -> (i32, i32) {
    %c0_i32 = arith.constant 0 : i32
    %c0_i32_0 = arith.constant 0 : i32
    %c0_i32_1 = arith.constant 0 : i32
    return %c0_i32, %c0_i32_0 : i32, i32
  }
  func.func @transform_8(%arg0: i32) -> (i32, i32) {
    %c0_i32 = arith.constant 0 : i32
    %c0_i32_0 = arith.constant 0 : i32
    %c0_i32_1 = arith.constant 0 : i32
    return %c0_i32, %c0_i32_0 : i32, i32
  }
  func.func @transform_9(%arg0: i32) -> (i32, i32) {
    %c0_i32 = arith.constant 0 : i32
    %c0_i32_0 = arith.constant 0 : i32
    %c0_i32_1 = arith.constant 0 : i32
    return %c0_i32, %c0_i32_0 : i32, i32
  }
  func.func @transform_10(%arg0: i32) -> (i32, i32) {
    %c0_i32 = arith.constant 0 : i32
    %c0_i32_0 = arith.constant 0 : i32
    %c0_i32_1 = arith.constant 0 : i32
    return %c0_i32, %c0_i32_0 : i32, i32
  }
  func.func @transform_11(%arg0: i32) -> (i32, i32) {
    %c0_i32 = arith.constant 0 : i32
    %c0_i32_0 = arith.constant 0 : i32
    %c0_i32_1 = arith.constant 0 : i32
    return %c0_i32, %c0_i32_0 : i32, i32
  }
}

module attributes {stable_mosaic.version = 11 : i64} {
  func.func @_head_kernel(%arg0: i32, %arg1: memref<64x48xf32, #tpu.memory_space<vmem>>, %arg2: memref<64x1xf32, #tpu.memory_space<vmem>>, %arg3: memref<2x8x12xf32, #tpu.memory_space<vmem>>, %arg4: memref<48x64xf32, #tpu.memory_space<vmem>>, %arg5: memref<16x64xf32, #tpu.memory_space<vmem>>, %arg6: memref<1x64xf32, #tpu.memory_space<vmem>>, %arg7: memref<48x64xf32, #tpu.memory_space<vmem>>, %arg8: memref<16x64xf32, #tpu.memory_space<vmem>>, %arg9: memref<1x64xf32, #tpu.memory_space<vmem>>, %arg10: memref<32x64xf32, #tpu.memory_space<vmem>>, %arg11: memref<1x64xf32, #tpu.memory_space<vmem>>, %arg12: memref<64x64xf32, #tpu.memory_space<vmem>>, %arg13: memref<2x48x12xf32, #tpu.memory_space<vmem>>, %arg14: memref<64x64xf32, #tpu.memory_space<vmem>>, %arg15: memref<64x64xf32, #tpu.memory_space<vmem>>, %arg16: memref<64x16xf32, #tpu.memory_space<vmem>>, %arg17: memref<64x16xf32, #tpu.memory_space<vmem>>) attributes {dimension_semantics = [#tpu.dimension_semantics<arbitrary>], iteration_bounds = array<i64: 1>, scalar_prefetch = 0 : i64, scratch_operands = 4 : i64, tpu.core_type = #tpu.core_type<tc>, window_params = [{pipeline_mode = #tpu.pipeline_mode<synchronous>, transform_indices = @transform_0, window_bounds = array<i64: 64, 48>}, {pipeline_mode = #tpu.pipeline_mode<synchronous>, transform_indices = @transform_1, window_bounds = array<i64: 64, 1>}, {pipeline_mode = #tpu.pipeline_mode<synchronous>, transform_indices = @transform_2, window_bounds = array<i64: 2, 8, 12>}, {pipeline_mode = #tpu.pipeline_mode<synchronous>, transform_indices = @transform_3, window_bounds = array<i64: 48, 64>}, {pipeline_mode = #tpu.pipeline_mode<synchronous>, transform_indices = @transform_4, window_bounds = array<i64: 16, 64>}, {pipeline_mode = #tpu.pipeline_mode<synchronous>, transform_indices = @transform_5, window_bounds = array<i64: 1, 64>}, {pipeline_mode = #tpu.pipeline_mode<synchronous>, transform_indices = @transform_6, window_bounds = array<i64: 48, 64>}, {pipeline_mode = #tpu.pipeline_mode<synchronous>, transform_indices = @transform_7, window_bounds = array<i64: 16, 64>}, {pipeline_mode = #tpu.pipeline_mode<synchronous>, transform_indices = @transform_8, window_bounds = array<i64: 1, 64>}, {pipeline_mode = #tpu.pipeline_mode<synchronous>, transform_indices = @transform_9, window_bounds = array<i64: 32, 64>}, {pipeline_mode = #tpu.pipeline_mode<synchronous>, transform_indices = @transform_10, window_bounds = array<i64: 1, 64>}, {pipeline_mode = #tpu.pipeline_mode<synchronous>, transform_indices = @transform_11, window_bounds = array<i64: 64, 64>}, {pipeline_mode = #tpu.pipeline_mode<synchronous>, transform_indices = @transform_12, window_bounds = array<i64: 2, 48, 12>}]} {
    %c0 = arith.constant 0 : index
    %c0_0 = arith.constant 0 : index
    %0 = vector.load %arg1[%c0, %c0_0] : memref<64x48xf32, #tpu.memory_space<vmem>>, vector<64x48xf32>
    %1 = arith.truncf %0 : vector<64x48xf32> to vector<64x48xbf16>
    %c0_1 = arith.constant 0 : index
    %c0_2 = arith.constant 0 : index
    %2 = vector.load %arg4[%c0_1, %c0_2] : memref<48x64xf32, #tpu.memory_space<vmem>>, vector<48x64xf32>
    %3 = arith.truncf %2 : vector<48x64xf32> to vector<48x64xbf16>
    %cst = arith.constant dense<0.000000e+00> : vector<64x64xf32>
    %4 = tpu.matmul %1, %3, %cst {dimension_numbers = #tpu.dot_dimension_numbers<[1], [0], [0], [1], [0, 0, 1, 1], [], []>} : vector<64x48xbf16>, vector<48x64xbf16>, vector<64x64xf32> -> vector<64x64xf32>
    %c0_3 = arith.constant 0 : index
    %c0_4 = arith.constant 0 : index
    %5 = vector.load %arg6[%c0_3, %c0_4] : memref<1x64xf32, #tpu.memory_space<vmem>>, vector<1x64xf32>
    %6 = vector.broadcast %5 : vector<1x64xf32> to vector<64x64xf32>
    %7 = arith.addf %4, %6 : vector<64x64xf32>
    %c0_5 = arith.constant 0 : index
    %c0_6 = arith.constant 0 : index
    %8 = vector.load %arg14[%c0_5, %c0_6] : memref<64x64xf32, #tpu.memory_space<vmem>>, vector<64x64xf32>
    tpu.vector_store %arg14[%c0_5, %c0_6], %7 {strides = array<i32>} : memref<64x64xf32, #tpu.memory_space<vmem>>, vector<64x64xf32>,
    %c0_7 = arith.constant 0 : index
    %c0_8 = arith.constant 0 : index
    %9 = vector.load %arg7[%c0_7, %c0_8] : memref<48x64xf32, #tpu.memory_space<vmem>>, vector<48x64xf32>
    %10 = arith.truncf %9 : vector<48x64xf32> to vector<48x64xbf16>
    %cst_9 = arith.constant dense<0.000000e+00> : vector<64x64xf32>
    %11 = tpu.matmul %1, %10, %cst_9 {dimension_numbers = #tpu.dot_dimension_numbers<[1], [0], [0], [1], [0, 0, 1, 1], [], []>} : vector<64x48xbf16>, vector<48x64xbf16>, vector<64x64xf32> -> vector<64x64xf32>
    %c0_10 = arith.constant 0 : index
    %c0_11 = arith.constant 0 : index
    %12 = vector.load %arg9[%c0_10, %c0_11] : memref<1x64xf32, #tpu.memory_space<vmem>>, vector<1x64xf32>
    %13 = vector.broadcast %12 : vector<1x64xf32> to vector<64x64xf32>
    %14 = arith.addf %11, %13 : vector<64x64xf32>
    %c0_12 = arith.constant 0 : index
    %c0_13 = arith.constant 0 : index
    %15 = vector.load %arg15[%c0_12, %c0_13] : memref<64x64xf32, #tpu.memory_space<vmem>>, vector<64x64xf32>
    tpu.vector_store %arg15[%c0_12, %c0_13], %14 {strides = array<i32>} : memref<64x64xf32, #tpu.memory_space<vmem>>, vector<64x64xf32>,
    %c0_14 = arith.constant 0 : index
    %c0_15 = arith.constant 0 : index
    %16 = vector.load %arg5[%c0_14, %c0_15] : memref<16x64xf32, #tpu.memory_space<vmem>>, vector<16x64xf32>
    %17 = arith.truncf %16 : vector<16x64xf32> to vector<16x64xbf16>
    %c0_16 = arith.constant 0 : index
    %c0_17 = arith.constant 0 : index
    %18 = vector.load %arg8[%c0_16, %c0_17] : memref<16x64xf32, #tpu.memory_space<vmem>>, vector<16x64xf32>
    %19 = arith.truncf %18 : vector<16x64xf32> to vector<16x64xbf16>
    %cst_18 = arith.constant 0.000000e+00 : f32
    %20 = vector.broadcast %cst_18 : f32 to vector<8x16xf32>
    %c0_i32 = arith.constant 0 : i32
    %c8_i32 = arith.constant 8 : i32
    %21 = arith.addi %c0_i32, %c8_i32 : i32
    %c1_i32 = arith.constant 1 : i32
    %22:4 = scf.for %arg18 = %c0_i32 to %21 step %c1_i32 iter_args(%arg19 = %20, %arg20 = %20, %arg21 = %20, %arg22 = %20) -> (vector<8x16xf32>, vector<8x16xf32>, vector<8x16xf32>, vector<8x16xf32>)  : i32 {
      %c8_i32_48 = arith.constant 8 : i32
      %50 = arith.muli %arg18, %c8_i32_48 : i32
      %51 = tpu.assume_multiple %50, 8 : i32
      %c7_i32 = arith.constant 7 : i32
      %52 = arith.subi %c7_i32, %arg18 : i32
      %c8_i32_49 = arith.constant 8 : i32
      %53 = arith.muli %52, %c8_i32_49 : i32
      %54 = tpu.assume_multiple %53, 8 : i32
      %55 = arith.index_cast %51 : i32 to index
      %c0_50 = arith.constant 0 : index
      %56 = vector.load %arg14[%55, %c0_50] : memref<64x64xf32, #tpu.memory_space<vmem>>, vector<8x64xf32>
      %57 = arith.truncf %arg19 : vector<8x16xf32> to vector<8x16xbf16>
      %cst_51 = arith.constant dense<0.000000e+00> : vector<8x64xf32>
      %58 = tpu.matmul %57, %17, %cst_51 {dimension_numbers = #tpu.dot_dimension_numbers<[1], [0], [0], [1], [0, 0, 1, 1], [], []>} : vector<8x16xbf16>, vector<16x64xbf16>, vector<8x64xf32> -> vector<8x64xf32>
      %59 = arith.addf %56, %58 : vector<8x64xf32>
      %60 = vector.extract_strided_slice %59 {offsets = [0, 0], sizes = [8, 16], strides = [1, 1]} : vector<8x64xf32> to vector<8x16xf32>
      %61 = arith.negf %60 : vector<8x16xf32>
      %62 = math.exp %61 : vector<8x16xf32>
      %cst_52 = arith.constant 1.000000e+00 : f32
      %63 = vector.broadcast %cst_52 : f32 to vector<8x16xf32>
      %64 = arith.addf %63, %62 : vector<8x16xf32>
      %65 = arith.divf %63, %64 : vector<8x16xf32>
      %66 = vector.extract_strided_slice %59 {offsets = [0, 16], sizes = [8, 16], strides = [1, 1]} : vector<8x64xf32> to vector<8x16xf32>
      %67 = arith.negf %66 : vector<8x16xf32>
      %68 = math.exp %67 : vector<8x16xf32>
      %cst_53 = arith.constant 1.000000e+00 : f32
      %69 = vector.broadcast %cst_53 : f32 to vector<8x16xf32>
      %70 = arith.addf %69, %68 : vector<8x16xf32>
      %71 = arith.divf %69, %70 : vector<8x16xf32>
      %72 = vector.extract_strided_slice %59 {offsets = [0, 32], sizes = [8, 16], strides = [1, 1]} : vector<8x64xf32> to vector<8x16xf32>
      %73 = math.tanh %72 : vector<8x16xf32>
      %74 = vector.extract_strided_slice %59 {offsets = [0, 48], sizes = [8, 16], strides = [1, 1]} : vector<8x64xf32> to vector<8x16xf32>
      %75 = arith.negf %74 : vector<8x16xf32>
      %76 = math.exp %75 : vector<8x16xf32>
      %cst_54 = arith.constant 1.000000e+00 : f32
      %77 = vector.broadcast %cst_54 : f32 to vector<8x16xf32>
      %78 = arith.addf %77, %76 : vector<8x16xf32>
      %79 = arith.divf %77, %78 : vector<8x16xf32>
      %80 = arith.mulf %71, %arg20 : vector<8x16xf32>
      %81 = arith.mulf %65, %73 : vector<8x16xf32>
      %82 = arith.addf %80, %81 : vector<8x16xf32>
      %83 = math.tanh %82 : vector<8x16xf32>
      %84 = arith.mulf %79, %83 : vector<8x16xf32>
      %85 = arith.index_cast %51 : i32 to index
      %c0_55 = arith.constant 0 : index
      %86 = vector.load %arg2[%85, %c0_55] : memref<64x1xf32, #tpu.memory_space<vmem>>, vector<8x1xf32>
      %87 = vector.broadcast %86 : vector<8x1xf32> to vector<8x16xf32>
      %88 = arith.mulf %84, %87 : vector<8x16xf32>
      %89 = vector.broadcast %86 : vector<8x1xf32> to vector<8x16xf32>
      %90 = arith.mulf %82, %89 : vector<8x16xf32>
      %91 = arith.index_cast %51 : i32 to index
      %c0_56 = arith.constant 0 : index
      %92 = vector.load %arg16[%91, %c0_56] : memref<64x16xf32, #tpu.memory_space<vmem>>, vector<8x16xf32>
      tpu.vector_store %arg16[%91, %c0_56], %88 {strides = array<i32>} : memref<64x16xf32, #tpu.memory_space<vmem>>, vector<8x16xf32>,
      %93 = arith.index_cast %54 : i32 to index
      %c0_57 = arith.constant 0 : index
      %94 = vector.load %arg15[%93, %c0_57] : memref<64x64xf32, #tpu.memory_space<vmem>>, vector<8x64xf32>
      %95 = arith.truncf %arg21 : vector<8x16xf32> to vector<8x16xbf16>
      %cst_58 = arith.constant dense<0.000000e+00> : vector<8x64xf32>
      %96 = tpu.matmul %95, %19, %cst_58 {dimension_numbers = #tpu.dot_dimension_numbers<[1], [0], [0], [1], [0, 0, 1, 1], [], []>} : vector<8x16xbf16>, vector<16x64xbf16>, vector<8x64xf32> -> vector<8x64xf32>
      %97 = arith.addf %94, %96 : vector<8x64xf32>
      %98 = vector.extract_strided_slice %97 {offsets = [0, 0], sizes = [8, 16], strides = [1, 1]} : vector<8x64xf32> to vector<8x16xf32>
      %99 = arith.negf %98 : vector<8x16xf32>
      %100 = math.exp %99 : vector<8x16xf32>
      %cst_59 = arith.constant 1.000000e+00 : f32
      %101 = vector.broadcast %cst_59 : f32 to vector<8x16xf32>
      %102 = arith.addf %101, %100 : vector<8x16xf32>
      %103 = arith.divf %101, %102 : vector<8x16xf32>
      %104 = vector.extract_strided_slice %97 {offsets = [0, 16], sizes = [8, 16], strides = [1, 1]} : vector<8x64xf32> to vector<8x16xf32>
      %105 = arith.negf %104 : vector<8x16xf32>
      %106 = math.exp %105 : vector<8x16xf32>
      %cst_60 = arith.constant 1.000000e+00 : f32
      %107 = vector.broadcast %cst_60 : f32 to vector<8x16xf32>
      %108 = arith.addf %107, %106 : vector<8x16xf32>
      %109 = arith.divf %107, %108 : vector<8x16xf32>
      %110 = vector.extract_strided_slice %97 {offsets = [0, 32], sizes = [8, 16], strides = [1, 1]} : vector<8x64xf32> to vector<8x16xf32>
      %111 = math.tanh %110 : vector<8x16xf32>
      %112 = vector.extract_strided_slice %97 {offsets = [0, 48], sizes = [8, 16], strides = [1, 1]} : vector<8x64xf32> to vector<8x16xf32>
      %113 = arith.negf %112 : vector<8x16xf32>
      %114 = math.exp %113 : vector<8x16xf32>
      %cst_61 = arith.constant 1.000000e+00 : f32
      %115 = vector.broadcast %cst_61 : f32 to vector<8x16xf32>
      %116 = arith.addf %115, %114 : vector<8x16xf32>
      %117 = arith.divf %115, %116 : vector<8x16xf32>
      %118 = arith.mulf %109, %arg22 : vector<8x16xf32>
      %119 = arith.mulf %103, %111 : vector<8x16xf32>
      %120 = arith.addf %118, %119 : vector<8x16xf32>
      %121 = math.tanh %120 : vector<8x16xf32>
      %122 = arith.mulf %117, %121 : vector<8x16xf32>
      %123 = arith.index_cast %54 : i32 to index
      %c0_62 = arith.constant 0 : index
      %124 = vector.load %arg2[%123, %c0_62] : memref<64x1xf32, #tpu.memory_space<vmem>>, vector<8x1xf32>
      %125 = vector.broadcast %124 : vector<8x1xf32> to vector<8x16xf32>
      %126 = arith.mulf %122, %125 : vector<8x16xf32>
      %127 = vector.broadcast %124 : vector<8x1xf32> to vector<8x16xf32>
      %128 = arith.mulf %120, %127 : vector<8x16xf32>
      %129 = arith.index_cast %54 : i32 to index
      %c0_63 = arith.constant 0 : index
      %130 = vector.load %arg17[%129, %c0_63] : memref<64x16xf32, #tpu.memory_space<vmem>>, vector<8x16xf32>
      tpu.vector_store %arg17[%129, %c0_63], %126 {strides = array<i32>} : memref<64x16xf32, #tpu.memory_space<vmem>>, vector<8x16xf32>,
      scf.yield %88, %90, %126, %128 : vector<8x16xf32>, vector<8x16xf32>, vector<8x16xf32>, vector<8x16xf32>
    }
    %c8_i32_19 = arith.constant 8 : i32
    %c0_20 = arith.constant 0 : index
    %c0_21 = arith.constant 0 : index
    %23 = vector.load %arg16[%c0_20, %c0_21] : memref<64x16xf32, #tpu.memory_space<vmem>>, vector<64x16xf32>
    %c0_22 = arith.constant 0 : index
    %c0_23 = arith.constant 0 : index
    %24 = vector.load %arg17[%c0_22, %c0_23] : memref<64x16xf32, #tpu.memory_space<vmem>>, vector<64x16xf32>
    %25 = tpu.concatenate %23, %24 in 1 : vector<64x16xf32>, vector<64x16xf32> -> vector<64x32xf32>
    %26 = arith.truncf %25 : vector<64x32xf32> to vector<64x32xbf16>
    %c0_24 = arith.constant 0 : index
    %c0_25 = arith.constant 0 : index
    %27 = vector.load %arg10[%c0_24, %c0_25] : memref<32x64xf32, #tpu.memory_space<vmem>>, vector<32x64xf32>
    %28 = arith.truncf %27 : vector<32x64xf32> to vector<32x64xbf16>
    %cst_26 = arith.constant dense<0.000000e+00> : vector<64x64xf32>
    %29 = tpu.matmul %26, %28, %cst_26 {dimension_numbers = #tpu.dot_dimension_numbers<[1], [0], [0], [1], [0, 0, 1, 1], [], []>} : vector<64x32xbf16>, vector<32x64xbf16>, vector<64x64xf32> -> vector<64x64xf32>
    %c0_27 = arith.constant 0 : index
    %c0_28 = arith.constant 0 : index
    %30 = vector.load %arg11[%c0_27, %c0_28] : memref<1x64xf32, #tpu.memory_space<vmem>>, vector<1x64xf32>
    %31 = vector.broadcast %30 : vector<1x64xf32> to vector<64x64xf32>
    %32 = arith.addf %29, %31 : vector<64x64xf32>
    %c0_29 = arith.constant 0 : index
    %c0_30 = arith.constant 0 : index
    %33 = vector.load %arg12[%c0_29, %c0_30] : memref<64x64xf32, #tpu.memory_space<vmem>>, vector<64x64xf32>
    tpu.vector_store %arg12[%c0_29, %c0_30], %32 {strides = array<i32>} : memref<64x64xf32, #tpu.memory_space<vmem>>, vector<64x64xf32>,
    %c0_31 = arith.constant 0 : index
    %c0_32 = arith.constant 0 : index
    %34 = tpu.strided_load %arg1[%c0_31, %c0_32] {strides = array<i32: 8, 1>} : memref<64x48xf32, #tpu.memory_space<vmem>>, vector<8x48xf32>
    %35 = tpu.transpose %34, [1, 0] : vector<8x48xf32> -> vector<48x8xf32>
    %c0_33 = arith.constant 0 : index
    %c0_34 = arith.constant 0 : index
    %c0_35 = arith.constant 0 : index
    %36 = vector.load %arg3[%c0_33, %c0_34, %c0_35] : memref<2x8x12xf32, #tpu.memory_space<vmem>>, vector<1x8x12xf32>
    %37 = vector.shape_cast %36 : vector<1x8x12xf32> to vector<8x12xf32>
    %cst_36 = arith.constant dense<0.000000e+00> : vector<48x12xf32>
    %38 = tpu.matmul %35, %37, %cst_36 {dimension_numbers = #tpu.dot_dimension_numbers<[1], [0], [0], [1], [0, 0, 1, 1], [], []>} : vector<48x8xf32>, vector<8x12xf32>, vector<48x12xf32> -> vector<48x12xf32>
    %c0_37 = arith.constant 0 : index
    %c0_38 = arith.constant 0 : index
    %c0_39 = arith.constant 0 : index
    %39 = vector.load %arg13[%c0_37, %c0_38, %c0_39] : memref<2x48x12xf32, #tpu.memory_space<vmem>>, vector<1x48x12xf32>
    %40 = vector.shape_cast %39 : vector<1x48x12xf32> to vector<48x12xf32>
    %41 = vector.shape_cast %38 : vector<48x12xf32> to vector<1x48x12xf32>
    tpu.vector_store %arg13[%c0_37, %c0_38, %c0_39], %41 {strides = array<i32>} : memref<2x48x12xf32, #tpu.memory_space<vmem>>, vector<1x48x12xf32>,
    %c1 = arith.constant 1 : index
    %c0_40 = arith.constant 0 : index
    %42 = tpu.strided_load %arg1[%c1, %c0_40] {strides = array<i32: 8, 1>} : memref<64x48xf32, #tpu.memory_space<vmem>>, vector<8x48xf32>
    %43 = tpu.transpose %42, [1, 0] : vector<8x48xf32> -> vector<48x8xf32>
    %c1_41 = arith.constant 1 : index
    %c0_42 = arith.constant 0 : index
    %c0_43 = arith.constant 0 : index
    %44 = vector.load %arg3[%c1_41, %c0_42, %c0_43] : memref<2x8x12xf32, #tpu.memory_space<vmem>>, vector<1x8x12xf32>
    %45 = vector.shape_cast %44 : vector<1x8x12xf32> to vector<8x12xf32>
    %cst_44 = arith.constant dense<0.000000e+00> : vector<48x12xf32>
    %46 = tpu.matmul %43, %45, %cst_44 {dimension_numbers = #tpu.dot_dimension_numbers<[1], [0], [0], [1], [0, 0, 1, 1], [], []>} : vector<48x8xf32>, vector<8x12xf32>, vector<48x12xf32> -> vector<48x12xf32>
    %c1_45 = arith.constant 1 : index
    %c0_46 = arith.constant 0 : index
    %c0_47 = arith.constant 0 : index
    %47 = vector.load %arg13[%c1_45, %c0_46, %c0_47] : memref<2x48x12xf32, #tpu.memory_space<vmem>>, vector<1x48x12xf32>
    %48 = vector.shape_cast %47 : vector<1x48x12xf32> to vector<48x12xf32>
    %49 = vector.shape_cast %46 : vector<48x12xf32> to vector<1x48x12xf32>
    tpu.vector_store %arg13[%c1_45, %c0_46, %c0_47], %49 {strides = array<i32>} : memref<2x48x12xf32, #tpu.memory_space<vmem>>, vector<1x48x12xf32>,
    return
  }
  func.func @transform_0(%arg0: i32) -> (i32, i32) {
    %c0_i32 = arith.constant 0 : i32
    %c0_i32_0 = arith.constant 0 : i32
    %c0_i32_1 = arith.constant 0 : i32
    return %c0_i32, %c0_i32_0 : i32, i32
  }
  func.func @transform_1(%arg0: i32) -> (i32, i32) {
    %c0_i32 = arith.constant 0 : i32
    %c0_i32_0 = arith.constant 0 : i32
    %c0_i32_1 = arith.constant 0 : i32
    return %c0_i32, %c0_i32_0 : i32, i32
  }
  func.func @transform_2(%arg0: i32) -> (i32, i32, i32) {
    %c0_i32 = arith.constant 0 : i32
    %c0_i32_0 = arith.constant 0 : i32
    %c0_i32_1 = arith.constant 0 : i32
    %c0_i32_2 = arith.constant 0 : i32
    return %c0_i32, %c0_i32_0, %c0_i32_1 : i32, i32, i32
  }
  func.func @transform_3(%arg0: i32) -> (i32, i32) {
    %c0_i32 = arith.constant 0 : i32
    %c0_i32_0 = arith.constant 0 : i32
    %c0_i32_1 = arith.constant 0 : i32
    return %c0_i32, %c0_i32_0 : i32, i32
  }
  func.func @transform_4(%arg0: i32) -> (i32, i32) {
    %c0_i32 = arith.constant 0 : i32
    %c0_i32_0 = arith.constant 0 : i32
    %c0_i32_1 = arith.constant 0 : i32
    return %c0_i32, %c0_i32_0 : i32, i32
  }
  func.func @transform_5(%arg0: i32) -> (i32, i32) {
    %c0_i32 = arith.constant 0 : i32
    %c0_i32_0 = arith.constant 0 : i32
    %c0_i32_1 = arith.constant 0 : i32
    return %c0_i32, %c0_i32_0 : i32, i32
  }
  func.func @transform_6(%arg0: i32) -> (i32, i32) {
    %c0_i32 = arith.constant 0 : i32
    %c0_i32_0 = arith.constant 0 : i32
    %c0_i32_1 = arith.constant 0 : i32
    return %c0_i32, %c0_i32_0 : i32, i32
  }
  func.func @transform_7(%arg0: i32) -> (i32, i32) {
    %c0_i32 = arith.constant 0 : i32
    %c0_i32_0 = arith.constant 0 : i32
    %c0_i32_1 = arith.constant 0 : i32
    return %c0_i32, %c0_i32_0 : i32, i32
  }
  func.func @transform_8(%arg0: i32) -> (i32, i32) {
    %c0_i32 = arith.constant 0 : i32
    %c0_i32_0 = arith.constant 0 : i32
    %c0_i32_1 = arith.constant 0 : i32
    return %c0_i32, %c0_i32_0 : i32, i32
  }
  func.func @transform_9(%arg0: i32) -> (i32, i32) {
    %c0_i32 = arith.constant 0 : i32
    %c0_i32_0 = arith.constant 0 : i32
    %c0_i32_1 = arith.constant 0 : i32
    return %c0_i32, %c0_i32_0 : i32, i32
  }
  func.func @transform_10(%arg0: i32) -> (i32, i32) {
    %c0_i32 = arith.constant 0 : i32
    %c0_i32_0 = arith.constant 0 : i32
    %c0_i32_1 = arith.constant 0 : i32
    return %c0_i32, %c0_i32_0 : i32, i32
  }
  func.func @transform_11(%arg0: i32) -> (i32, i32) {
    %c0_i32 = arith.constant 0 : i32
    %c0_i32_0 = arith.constant 0 : i32
    %c0_i32_1 = arith.constant 0 : i32
    return %c0_i32, %c0_i32_0 : i32, i32
  }
  func.func @transform_12(%arg0: i32) -> (i32, i32, i32) {
    %c0_i32 = arith.constant 0 : i32
    %c0_i32_0 = arith.constant 0 : i32
    %c0_i32_1 = arith.constant 0 : i32
    %c0_i32_2 = arith.constant 0 : i32
    return %c0_i32, %c0_i32_0, %c0_i32_1 : i32, i32, i32
  }
}

</mosaic_0001>

<bundles_post_ra>
// kernel: mul.5
= control target key start
LH: loop header
LB: loop body
LE: loop exit
PB: predicated region body
PF: predicated region fallthrough
CT: control target
= control target key end

     0   :  { %s67_s10 = smov 56   ;;  %s68_s11 = smov 40   ;;  %vm3_vm0 = vcmask 64512   ;;  %vm9_vm1 = vcmask 523712   ;;  %vm15_vm2 = vcmask 458112   ;;  %vm21_vm3 = vcmask 392512   ;;  %s111_s0 = inlined_call_operand.vmem [shape: f32[8,8], index: 0, kind: input, shape index: {}]   ;;  %s112_s1 = inlined_call_operand.vmem [shape: f32[64], index: 1, kind: output, shape index: {}]  }
   0x1   :  { %v53_v0 = vld [vmem:[%s111_s0 + $0x7] sm:$0x1]   ;;  %v55_v1 = vld [vmem:[%s111_s0 + $0x5] sm:$0x1]   ;;  %v54_v2 = vld [vmem:[%s111_s0 + $0x6] sm:$0x1]  }
   0x2   :  { %7 = vrot.lane.b32.xlu0 %v53_v0, %s67_s10  ;;  %19 = vrot.lane.b32.xlu1 %v55_v1, %s68_s11  ;;  %v56_v3 = vld [vmem:[%s111_s0 + $0x4] sm:$0x1]   ;;  %v2_v4 = vld [vmem:[%s111_s0] sm:$0x1]   ;;  %s69_s18 = smov 48   ;;  %s70_s19 = smov 32  }
   0x3   :  { %4 = vst.msk [vmem:[#allocation0] sm:$0x1] %vm3_vm0, %v2_v4   ;;  %v57_v5 = vld [vmem:[%s111_s0 + $0x3] sm:$0x1]   ;;  %v58_v6 = vld [vmem:[%s111_s0 + $0x2] sm:$0x1]  }
   0x4   :  { %s71_s24 = smov 24   ;;  %s72_s25 = smov 16   ;;  %v59_v7 = vld [vmem:[%s111_s0 + $0x1] sm:$0x1]   ;;  %vm27_vm4 = vcmask 326912   ;;  %vm33_vm5 = vcmask 261312  }
   0x5   :  { %s73_s0 = smov 8   ;;  %vm39_vm6 = vcmask 195712   ;;  %vm45_vm7 = vcmask 130112  }
   0x6   :  { %13 = vrot.lane.b32.xlu0 %v54_v2, %s69_s18  ;;  %25 = vrot.lane.b32.xlu1 %v56_v3, %s70_s19 }
   0xa   :  { %31 = vrot.lane.b32.xlu0 %v57_v5, %s71_s24  ;;  %37 = vrot.lane.b32.xlu1 %v58_v6, %s72_s25 }
   0xe   :  { %43 = vrot.lane.b32.xlu0 %v59_v7, %s73_s0 }
  0x74   :  { %v8_v8 = vpop.permute.xlu0 %7   ;;  %v20_v9 = vpop.permute.xlu1 %19  }
  0x75   :  { %10 = vst.msk [vmem:[#allocation0] sm:$0x1] %vm9_vm1, %v8_v8  }
  0x78   :  { %v14_v10 = vpop.permute.xlu0 %13   ;;  %v26_v11 = vpop.permute.xlu1 %25  }
  0x79   :  { %16 = vst.msk [vmem:[#allocation0] sm:$0x1] %vm15_vm2, %v14_v10  }
  0x7a   :  { %22 = vst.msk [vmem:[#allocation0] sm:$0x1] %vm21_vm3, %v20_v9  }
  0x7b   :  { %28 = vst.msk [vmem:[#allocation0] sm:$0x1] %vm27_vm4, %v26_v11  }
  0x7c   :  { %v32_v12 = vpop.permute.xlu0 %31   ;;  %v38_v13 = vpop.permute.xlu1 %37  }
  0x7d   :  { %34 = vst.msk [vmem:[#allocation0] sm:$0x1] %vm33_vm5, %v32_v12  }
  0x7e   :  { %40 = vst.msk [vmem:[#allocation0] sm:$0x1] %vm39_vm6, %v38_v13  }
  0x80   :  { %v44_v14 = vpop.permute.xlu0 %43  }
  0x81   :  { %46 = vst.msk [vmem:[#allocation0] sm:$0x1] %vm45_vm7, %v44_v14  }
  0x88   :  { %v50_v15 = vld [vmem:[#allocation0] sm:$0x1] }
  0x89   :  { %52 = vst [vmem:[%s112_s1] sm:$0x1] %v50_v15 }

// kernel: duration_predictor_forward.3
= control target key start
LH: loop header
LB: loop body
LE: loop exit
PB: predicated region body
PF: predicated region fallthrough
CT: control target
= control target key end

     0   :  { %vm67_vm0 = vcmask 392192   ;;  %vm145_vm1 = vcmask 523264   ;;  %s1695_s1 = inlined_call_operand.vmem [shape: f32[64,16], index: 1, kind: input, shape index: {}]   ;;  %s1696_s2 = inlined_call_operand.vmem [shape: f32[64,1], index: 2, kind: input, shape index: {}]   ;;  %s1697_s3 = inlined_call_operand.vmem [shape: f32[48,64], index: 3, kind: input, shape index: {}]   ;;  %s1698_s9 = inlined_call_operand.vmem [shape: f32[16,64], index: 9, kind: input, shape index: {}]   ;;  %s1699_s10 = inlined_call_operand.vmem [shape: f32[1,64], index: 10, kind: input, shape index: {}]   ;;  %s1700_s11 = inlined_call_operand.vmem [shape: f32[64,48], index: 11, kind: output, shape index: {}]   ;;  %s1701_s6 = inlined_call_operand.vmem [shape: f32[48,64], index: 6, kind: input, shape index: {}]   ;;  %s1702_s0 = inlined_call_operand.vmem [shape: f32[64,48], index: 0, kind: input, shape index: {}]   ;;  %s1703_s4 = inlined_call_operand.vmem [shape: f32[16,64], index: 4, kind: input, shape index: {}]   ;;  %s1704_s7 = inlined_call_operand.vmem [shape: f32[16,64], index: 7, kind: input, shape index: {}]   ;;  %s1705_s5 = inlined_call_operand.vmem [shape: f32[1,64], index: 5, kind: input, shape index: {}]   ;;  %s1706_s8 = inlined_call_operand.vmem [shape: f32[1,64], index: 8, kind: input, shape index: {}]  }
   0x1   :  { %v51_v0 = vld [vmem:[%s1697_s3] sm:$0xff]  ;;  %v52_v1 = vld [vmem:[%s1697_s3 + $0x8] sm:$0xff]  ;;  %v53_v5 = vld [vmem:[%s1697_s3 + $0x10] sm:$0xff] }
   0x2   :  { %v154_v2 = vld [vmem:[%s1701_s6] sm:$0xff]  ;;  %v57_v3 = vpack.c.bf16 %v52_v1, %v51_v0  ;;  %v155_v4 = vld [vmem:[%s1701_s6 + $0x8] sm:$0xff]  ;;  %v54_v6 = vld [vmem:[%s1697_s3 + $0x18] sm:$0xff] }
   0x3   :  { %v160_v7 = vpack.c.bf16 %v155_v4, %v154_v2  ;;  %v58_v8 = vpack.c.bf16 %v54_v6, %v53_v5  ;;  %v156_v9 = vld [vmem:[%s1701_s6 + $0x10] sm:$0xff]  ;;  %v157_v10 = vld [vmem:[%s1701_s6 + $0x18] sm:$0xff]  ;;  %v55_v11 = vld [vmem:[%s1697_s3 + $0x20] sm:$0xff]  ;;  %v1304_v6 = vmov 0.0  }
   0x4   :  { %940 = vmatprep.subr.bf16.mxu0 %v57_v3  ;;  %v161_v12 = vpack.c.bf16 %v157_v10, %v156_v9  ;;  %v56_v13 = vld [vmem:[%s1697_s3 + $0x28] sm:$0xff]  ;;  %v158_v14 = vld [vmem:[%s1701_s6 + $0x20] sm:$0xff]  ;;  %v41_v21 = vld [vmem:[%s1702_s0 + $0x10] sm:$0xff]  ;;  %v1310_v9 = vmov 0.0  }
   0x5   :  { %v159_v15 = vld [vmem:[%s1701_s6 + $0x28] sm:$0xff]  ;;  %954 = vmatprep.subr.bf16.mxu1 %v160_v7  ;;  %941 = vmatpush3.bf16.msra.mxu0 %v57_v3  ;;  %v39_v16 = vld [vmem:[%s1702_s0] sm:$0xff]  ;;  %v59_v18 = vpack.c.bf16 %v56_v13, %v55_v11  ;;  %v42_v22 = vld [vmem:[%s1702_s0 + $0x18] sm:$0xff] }
   0x6   :  { %v40_v17 = vld [vmem:[%s1702_s0 + $0x8] sm:$0xff]  ;;  %955 = vmatpush3.bf16.msra.mxu1 %v160_v7  ;;  %942 = vmatprep.subr.bf16.mxu0 %v58_v8  ;;  %v162_v20 = vpack.c.bf16 %v159_v15, %v158_v14  ;;  %v43_v23 = vld [vmem:[%s1702_s0 + $0x20] sm:$0xff]  ;;  %v48_v25 = vpack.c.bf16 %v42_v22, %v41_v21  ;;  %v45_v27 = vld [vmem:[%s1702_s0 + $0x30] sm:$0xff]  ;;  %v1306_v7 = vmov 0.0  }
   0x7   :  { %v47_v19 = vpack.c.bf16 %v40_v17, %v39_v16  ;;  %956 = vmatprep.subr.bf16.mxu1 %v161_v12  ;;  %v44_v24 = vld [vmem:[%s1702_s0 + $0x28] sm:$0xff]  ;;  %v46_v28 = vld [vmem:[%s1702_s0 + $0x38] sm:$0xff]  ;;  %v1261_v30 = vld [vmem:[%s1703_s4] sm:$0xff] }
   0x8   :  { %v49_v26 = vpack.c.bf16 %v44_v24, %v43_v23  ;;  %v50_v29 = vpack.c.bf16 %v46_v28, %v45_v27  ;;  %v1266_v31 = vld [vmem:[%s1703_s4 + $0x8] sm:$0xff]  ;;  %v1271_v32 = vld [vmem:[%s1704_s7] sm:$0xff] }
   0x9   :  { %946 = vmatprep.mubr.msk.bf16.mxu0 %vm67_vm0, %v47_v19  ;;  %960 = vmatprep.mubr.msk.bf16.mxu1 %vm67_vm0, %v47_v19  ;;  %v245_v33 = vpack.c.bf16 %v1266_v31, %v1261_v30  ;;  %v1278_v34 = vld [vmem:[%s1704_s7 + $0x8] sm:$0xff]  ;;  %v896_v36 = vld [vmem:[%s1705_s5] ss:$0 sm:$0xff]  ;;  %s1312_s5 = smov 0  }
   0xa   :  { %943 = vmatpush3.bf16.msra.mxu0 %v58_v8  ;;  %957 = vmatpush3.bf16.msra.mxu1 %v161_v12  ;;  %v248_v35 = vpack.c.bf16 %v1278_v34, %v1271_v32  ;;  %v901_v37 = vld [vmem:[%s1706_s8] ss:$0 sm:$0xff]  ;;  %v1308_v8 = vmov 0.0  }
   0xb   :  { %944 = vmatprep.subr.bf16.mxu0 %v59_v18  ;;  %958 = vmatprep.subr.bf16.mxu1 %v162_v20 }
   0xe   :  { %945 = vmatpush3.bf16.msra.mxu0 %v59_v18  ;;  %959 = vmatpush3.bf16.msra.mxu1 %v162_v20 }
  0x11   :  { %947 = vmatmul.mubr.msk.bf16.vlgmr.msra.gmra.mrb[0].mxu0 %vm67_vm0, %v48_v25  ;;  %961 = vmatmul.mubr.msk.bf16.vlgmr.msra.gmra.mrb[0].mxu1 %vm67_vm0, %v48_v25 }
  0x12   :  { %950 = vmatprep.mubr.msk.bf16.mxu0 %vm67_vm0, %v49_v26  ;;  %964 = vmatprep.mubr.msk.bf16.mxu1 %vm67_vm0, %v49_v26 }
  0x19   :  { %951 = vmatmul.mubr.msk.bf16.gmra.mrb[4].mxu0 %vm67_vm0, %v50_v29  ;;  %965 = vmatmul.mubr.msk.bf16.gmra.mrb[4].mxu1 %vm67_vm0, %v50_v29 }
  0xe4   :  { %v948_v38 = vpop.f32.mrb[0].mxu0  ;;  %v962_v40 = vpop.f32.mrb[0].mxu1 }
  0xe5   :  { %v123_v39 = vadd.f32 %v948_v38, %v896_v36  ;;  %v114_v41 = vpop.f32.mrb[1].mxu0  ;;  %v213_v42 = vadd.f32 %v962_v40, %v901_v37  ;;  %v204_v44 = vpop.f32.mrb[1].mxu1 }
  0xe6   :  { %v115_v43 = vadd.f32 %v896_v36, %v114_v41  ;;  %v949_v45 = vpop.f32.mrb[2].mxu0  ;;  %v205_v46 = vadd.f32 %v901_v37, %v204_v44  ;;  %v963_v48 = vpop.f32.mrb[2].mxu1 }
  0xe7   :  { %148 = vst.msk [vmem:[#allocation2 + $0x10] sm:$0xff] %vm145_vm1, %v123_v39  ;;  %v126_v47 = vadd.f32 %v949_v45, %v896_v36  ;;  %v117_v49 = vpop.f32.mrb[3].mxu0  ;;  %237 = vst.msk [vmem:[#allocation3 + $0x10] sm:$0xff] %vm145_vm1, %v213_v42  ;;  %v216_v50 = vadd.f32 %v963_v48, %v901_v37  ;;  %v207_v52 = vpop.f32.mrb[3].mxu1 }
  0xe8   :  { %146 = vst.msk [vmem:[#allocation2] sm:$0xff] %vm145_vm1, %v115_v43  ;;  %v118_v51 = vadd.f32 %v896_v36, %v117_v49  ;;  %235 = vst.msk [vmem:[#allocation3] sm:$0xff] %vm145_vm1, %v205_v46  ;;  %v208_v53 = vadd.f32 %v901_v37, %v207_v52 }
  0xe9   :  { %149 = vst.msk [vmem:[#allocation2 + $0x18] sm:$0xff] %vm145_vm1, %v126_v47  ;;  %238 = vst.msk [vmem:[#allocation3 + $0x18] sm:$0xff] %vm145_vm1, %v216_v50 }
  0xea   :  { %147 = vst.msk [vmem:[#allocation2 + $0x8] sm:$0xff] %vm145_vm1, %v118_v51  ;;  %236 = vst.msk [vmem:[#allocation3 + $0x8] sm:$0xff] %vm145_vm1, %v208_v53 }
  0xec   :  { %v952_v54 = vpop.f32.mrb[4].mxu0  ;;  %v966_v56 = vpop.f32.mrb[4].mxu1 }
  0xed   :  { %v139_v55 = vadd.f32 %v952_v54, %v896_v36  ;;  %v130_v57 = vpop.f32.mrb[5].mxu0  ;;  %v229_v58 = vadd.f32 %v966_v56, %v901_v37  ;;  %v220_v60 = vpop.f32.mrb[5].mxu1 }
  0xee   :  { %v131_v59 = vadd.f32 %v896_v36, %v130_v57  ;;  %v953_v61 = vpop.f32.mrb[6].mxu0  ;;  %v221_v62 = vadd.f32 %v901_v37, %v220_v60  ;;  %v967_v0 = vpop.f32.mrb[6].mxu1 }
  0xef   :  { %152 = vst.msk [vmem:[#allocation2 + $0x30] sm:$0xff] %vm145_vm1, %v139_v55  ;;  %v142_v63 = vadd.f32 %v953_v61, %v896_v36  ;;  %v133_v1 = vpop.f32.mrb[7].mxu0  ;;  %241 = vst.msk [vmem:[#allocation3 + $0x30] sm:$0xff] %vm145_vm1, %v229_v58  ;;  %v232_v2 = vadd.f32 %v967_v0, %v901_v37  ;;  %v223_v4 = vpop.f32.mrb[7].mxu1 }
  0xf0   :  { %150 = vst.msk [vmem:[#allocation2 + $0x20] sm:$0xff] %vm145_vm1, %v131_v59  ;;  %v134_v3 = vadd.f32 %v896_v36, %v133_v1  ;;  %239 = vst.msk [vmem:[#allocation3 + $0x20] sm:$0xff] %vm145_vm1, %v221_v62  ;;  %v224_v5 = vadd.f32 %v901_v37, %v223_v4 }
  0xf1   :  { %153 = vst.msk [vmem:[#allocation2 + $0x38] sm:$0xff] %vm145_vm1, %v142_v63  ;;  %242 = vst.msk [vmem:[#allocation3 + $0x38] sm:$0xff] %vm145_vm1, %v232_v2 }
  0xf2   :  { %151 = vst.msk [vmem:[#allocation2 + $0x28] sm:$0xff] %vm145_vm1, %v134_v3  ;;  %240 = vst.msk [vmem:[#allocation3 + $0x28] sm:$0xff] %vm145_vm1, %v224_v5 }
  0xf3 LB: > { %v1119_v10 = vmov 0.0   ;;  %vm1120_vm2 = vmmov 0   ;;  %v264_v11 = vpack.c.bf16 %v1113_v9, %v1113_v9  ;;  %s1121_s7 = smov 80   ;;  %v354_v12 = vpack.c.bf16 %v1105_v7, %v1105_v7  ;;  %s1336_s8 = sshll.u32 %s1117_s5, 3  ;;  %s1117_s5 = sphi %s1312_s5, %s254_s5   ;;  %v1113_v9 = vphi %v1310_v9, %v344_v9   ;;  %v1109_v8 = vphi %v1308_v8, %v345_v8   ;;  %v1105_v7 = vphi %v1306_v7, %v433_v7   ;;  %v1101_v6 = vphi %v1304_v6, %v434_v6  }
  0xf4   : > { %968 = vmatprep.subr.bf16.mxu0 %v1119_v10  ;;  %970 = vmatprep.mubr.msk.bf16.mxu0 %vm1120_vm2, %v1119_v10  ;;  %vm268_vm3 = vcmask 130048   ;;  %s260_s6 = ssub.s32 7, %s1117_s5  ;;  %s262_s27 = scalar_lea.vmem [#allocation2], %s1336_s8  ;;  %v1122_v26 = vmov 0  }
  0xf5   : > { %969 = vmatpush3.bf16.msra.mxu0 %v245_v33  ;;  %974 = vmatprep.subr.bf16.mxu1 %v1119_v10  ;;  %s1339_s26 = sshll.u32 %s260_s6, 3  ;;  %s1123_s29 = smov 96  }
  0xf6   : > { %975 = vmatpush3.bf16.msra.mxu1 %v248_v35  ;;  %976 = vmatprep.mubr.msk.bf16.mxu1 %vm1120_vm2, %v1119_v10  ;;  %s352_s28 = scalar_lea.vmem [#allocation3], %s1339_s26  ;;  %s337_s13 = scalar_lea.vmem %s1696_s2, %s1336_s8 }
  0xf7   : > { %266 = vrot.lane.b32.xlu0 %v264_v11, %s1121_s7  ;;  %1044 = vset.pattern.permute.xlu1 %v1122_v26  ;;  %s1124_s14 = smov 16   ;;  %v338_v47 = vld [vmem:[%s337_s13] sm:$0xff]  ;;  %s426_s17 = scalar_lea.vmem %s1696_s2, %s1339_s26 }
  0xf8   : > { %1043 = vset.pattern.permute.xlu0 %v1122_v26  ;;  %v427_v49 = vld [vmem:[%s426_s17] sm:$0xff]  ;;  %s1125_s18 = smov 32   ;;  %s350_s19 = scalar_lea.vmem [#allocation4], %s1336_s8 }
  0xf9   : > { %v263_v15 = vld [vmem:[%s262_s27] sm:$0xff]  ;;  %s439_s20 = scalar_lea.vmem [#allocation5], %s1339_s26  ;;  %s254_s5 = sadd.s32 1, %s1117_s5  }
  0xfa   : > { %v353_v20 = vld [vmem:[%s352_s28] sm:$0xff]  ;;  %p251_p0 = scmp.ge.s32.totalorder %s254_s5, 8  }
  0xfb   : > { %356 = vrot.lane.b32.xlu0 %v354_v12, %s1121_s7  ;;  %v510_v3 = vld [vmem:[%s1698_s9] sm:$0xff] (%p251_p0)  ;;  %v511_v4 = vld [vmem:[%s1698_s9 + $0x8] sm:$0xff] (%p251_p0)  ;;  %s1126_s24 = smov (%p251_p0), 16   ;;  %v1127_v30 = vmov (%p251_p0), 0   ;;  %v1391_v32 = vld [vmem:[%s1695_s1 + $0x10] sm:$0xff] (%p251_p0)  ;;  %vm597_vm4 = vcmask (%p251_p0), 261120  }
  0xfc   :  { %v512_v5 = vpack.c.bf16 (%p251_p0), %v511_v4, %v510_v3  ;;  %v1386_v31 = vld [vmem:[%s1695_s1 + $0x8] sm:$0xff] (%p251_p0)  ;;  %v1396_v33 = vld [vmem:[%s1695_s1 + $0x18] sm:$0xff] (%p251_p0)  ;;  %v1415_v12 = vld [vmem:[%s1695_s1 + $0x30] sm:$0xff] (%p251_p0)  ;;  %s1129_s8 = smov (%p251_p0), 96  }
  0xfd   :  { %v507_v35 = vpack.c.bf16 (%p251_p0), %v1396_v33, %v1391_v32  ;;  %v805_v26 = vld [vmem:[%s1696_s2 + $0x30] sm:$0xff] (%p251_p0) }
  0xfe   :  { %980 = vmatprep.subr.bf16.mxu0 (%p251_p0), %v512_v5  ;;  %990 = vmatprep.subr.bf16.mxu1 (%p251_p0), %v512_v5 }
 0x169   : > { %v267_v13 = vpop.permute.xlu0 %266 }
 0x16a   : > { %971 = vmatmul.mubr.msk.bf16.vlgmr.msra.gmra.mrb[0].mxu0 %vm268_vm3, %v267_v13  ;;  %v1420_v13 = vld [vmem:[%s1695_s1 + $0x38] sm:$0xff] (%p251_p0) }
 0x16b   :  { %981 = vmatpush3.bf16.msra.mxu0 (%p251_p0), %v512_v5 }
 0x16d   : > { %v357_v14 = vpop.permute.xlu0 %356 }
 0x16e   : > { %977 = vmatmul.mubr.msk.bf16.vlgmr.msra.gmra.mrb[0].mxu1 %vm268_vm3, %v357_v14 }
 0x16f   :  { %991 = vmatpush3.bf16.msra.mxu1 (%p251_p0), %v512_v5 }
 0x23d   : > { %v306_v16 = vpop.f32.mrb[0].mxu0 }
 0x23e   : > { %v312_v17 = vadd.f32 %v306_v16, %v263_v15  ;;  %v972_v18 = vpop.f32.mrb[1].mxu0  ;;  %v509_v15 = vpack.c.bf16 (%p251_p0), %v1420_v13, %v1415_v12 }
 0x23f   : > { %v309_v19 = vpop.f32.mrb[2].mxu0 }
 0x240   : > { %1045 = vtanh.f32 %v312_v17  ;;  %v973_v21 = vpop.f32.mrb[3].mxu0  ;;  %v909_v36 = vmul.f32 -1.442695, %v312_v17 }
 0x241   : > { %v395_v22 = vpop.f32.mrb[0].mxu1  ;;  %v800_v21 = vld [vmem:[%s1696_s2 + $0x8] sm:$0xff] (%p251_p0) }
 0x242   : > { %v401_v23 = vadd.f32 %v395_v22, %v353_v20  ;;  %v978_v24 = vpop.f32.mrb[1].mxu1  ;;  %v799_v20 = vld [vmem:[%s1696_s2] sm:$0xff] (%p251_p0)  ;;  %v801_v22 = vld [vmem:[%s1696_s2 + $0x10] sm:$0xff] (%p251_p0) }
 0x243   : > { %v398_v25 = vpop.f32.mrb[2].mxu1  ;;  %v803_v24 = vld [vmem:[%s1696_s2 + $0x20] sm:$0xff] (%p251_p0) }
 0x244   : > { %1047 = vtanh.f32 %v401_v23  ;;  %v979_v27 = vpop.f32.mrb[3].mxu1  ;;  %v911_v37 = vmul.f32 -1.442695, %v401_v23  ;;  %v802_v23 = vld [vmem:[%s1696_s2 + $0x18] sm:$0xff] (%p251_p0)  ;;  %v804_v25 = vld [vmem:[%s1696_s2 + $0x28] sm:$0xff] (%p251_p0) }
 0x245   : > { %1049 = vpow2.f32 %v909_v36  ;;  %v806_v27 = vld [vmem:[%s1696_s2 + $0x38] sm:$0xff] (%p251_p0)  ;;  %s1128_s2 = smov (%p251_p0), 32  }
 0x246   : > { %1051 = vpow2.f32 %v911_v37 }
 0x24a   : > { %v1046_v28 = vpop.eup %1045 }
 0x24b   : > { %322 = vrot.lane.b32.xlu1 %v1046_v28, %s1123_s29 }
 0x24e   : > { %v1048_v29 = vpop.eup %1047 }
 0x24f   : > { %411 = vrot.lane.b32.xlu1 %v1048_v29, %s1123_s29  ;;  %v1050_v38 = vpop.eup %1049 }
 0x250   : > { %v316_v39 = vadd.f32 1.0, %v1050_v38  ;;  %v1052_v40 = vpop.eup %1051 }
 0x251   : > { %v405_v41 = vadd.f32 1.0, %v1052_v40 }
 0x252   : > { %1053 = vrcp.f32 %v316_v39 }
 0x253   : > { %1055 = vrcp.f32 %v405_v41 }
 0x25c   : > { %v1054_v42 = vpop.eup %1053 }
 0x25d   : > { %v1056_v45 = vpop.eup %1055  ;;  %v320_v50 = vmul.f32 %v1109_v8, %v1054_v42 }
 0x25e   : > { %v409_v53 = vmul.f32 %v1101_v6, %v1056_v45 }
 0x2bd   : > { %v323_v43 = vpop.permute.xlu1 %322 }
 0x2be   : > { %v325_v44 = vmul.f32 %v1054_v42, %v323_v43 }
 0x2c0   : > { %327 = vrot.lane.b32.xlu0 %v325_v44, %s1124_s14 }
 0x2c1   : > { %v412_v46 = vpop.permute.xlu1 %411 }
 0x2c2   : > { %v414_v48 = vmul.f32 %v1056_v45, %v412_v46 }
 0x2c4   : > { %341 = vperm.xlu0 %1043, %v338_v47   ;;  %416 = vrot.lane.b32.xlu1 %v414_v48, %s1124_s14 }
 0x2c8   : > { %430 = vperm.xlu1 %1044, %v427_v49   ;;  %1061 = vset.pattern.permute.xlu0 (%p251_p0), %v1127_v30 }
 0x2cc   :  { %1062 = vset.pattern.permute.xlu1 (%p251_p0), %v1127_v30 }
 0x332   : > { %v328_v51 = vpop.permute.xlu0 %327 }
 0x333   : > { %v330_v52 = vadd.f32 %v328_v51, %v320_v50 }
 0x335   : > { %1057 = vtanh.f32 %v330_v52 }
 0x336   : > { %v417_v54 = vpop.permute.xlu1 %416 }
 0x337   : > { %v419_v55 = vadd.f32 %v417_v54, %v409_v53 }
 0x339   : > { %1059 = vtanh.f32 %v419_v55 }
 0x33f   : > { %v1058_v56 = vpop.eup %1057 }
 0x340   : > { %333 = vrot.lane.b32.xlu1 %v1058_v56, %s1125_s18 }
 0x343   : > { %v1060_v57 = vpop.eup %1059  ;;  %v342_v58 = vpop.permute.xlu0 %341 }
 0x344   : > { %v345_v8 = vmul.f32 %v342_v58, %v330_v52   ;;  %422 = vrot.lane.b32.xlu0 %v1060_v57, %s1125_s18 }
 0x345   :  { %v1410_v8 = vld [vmem:[%s1695_s1 + $0x28] sm:$0xff] (%p251_p0) }
 0x347   : > { %v431_v59 = vpop.permute.xlu1 %430 }
 0x348   : > { %v434_v6 = vmul.f32 %v431_v59, %v419_v55  }
 0x3b2   : > { %v334_v60 = vpop.permute.xlu1 %333 }
 0x3b3   : > { %v336_v61 = vmul.f32 %v1054_v42, %v334_v60 }
 0x3b5   : > { %v344_v9 = vmul.f32 %v342_v58, %v336_v61  }
 0x3b6   : > { %v423_v62 = vpop.permute.xlu0 %422 }
 0x3b7   : > { %v425_v63 = vmul.f32 %v1056_v45, %v423_v62  ;;  %347 = vrot.lane.b32.xlu1 %v344_v9, %s1121_s7  ;;  %v1380_v9 = vld [vmem:[%s1695_s1] sm:$0xff] (%p251_p0) }
 0x3b8   :  { %v506_v34 = vpack.c.bf16 (%p251_p0), %v1386_v31, %v1380_v9 }
 0x3b9   : > { %v433_v7 = vmul.f32 %v431_v59, %v425_v63  }
 0x3ba   :  { %982 = vmatprep.mubr.msk.bf16.mxu0 (%p251_p0), %vm268_vm3, %v506_v34 }
 0x3bb   : > { %436 = vrot.lane.b32.xlu0 %v433_v7, %s1121_s7  ;;  %v1405_v7 = vld [vmem:[%s1695_s1 + $0x20] sm:$0xff] (%p251_p0)  ;;  %983 = vmatmul.mubr.msk.bf16.vlgmr.msra.gmra.mrb[0].mxu0 (%p251_p0), %vm268_vm3, %v507_v35 }
 0x3bc   :  { %v508_v14 = vpack.c.bf16 (%p251_p0), %v1410_v8, %v1405_v7 }
 0x3be   :  { %986 = vmatprep.mubr.msk.bf16.mxu1 (%p251_p0), %vm268_vm3, %v508_v14 }
 0x3bf   :  { %987 = vmatmul.mubr.msk.bf16.vlgmr.msra.gmra.mrb[0].mxu1 (%p251_p0), %vm268_vm3, %v509_v15 }
 0x428   :  { %253 = sbr.rel (!%p251_p0) target bundleno = 243 (0xf3), region = 77 }
 0x429   : > { %v348_v0 = vpop.permute.xlu1 %347 }
 0x42a   : > { %351 = vst.msk [vmem:[%s350_s19] sm:$0xff] %vm268_vm3, %v348_v0 }
 0x42d   : > { %v437_v1 = vpop.permute.xlu0 %436 }
 0x42e   : > { %440 = vst.msk [vmem:[%s439_s20] sm:$0xff] %vm268_vm3, %v437_v1 }
 0x431   :  { %v441_v28 = vld [vmem:[#allocation4] sm:$0xff]  ;;  %v443_v29 = vld [vmem:[#allocation4 + $0x10] sm:$0xff]  ;;  %v442_v41 = vld [vmem:[#allocation4 + $0x8] sm:$0xff] }
 0x432   :  { %v444_v42 = vld [vmem:[#allocation4 + $0x18] sm:$0xff]  ;;  %v445_v49 = vld [vmem:[#allocation4 + $0x20] sm:$0xff]  ;;  %v446_v50 = vld [vmem:[#allocation4 + $0x28] sm:$0xff] }
 0x433   :  { %v447_v57 = vld [vmem:[#allocation4 + $0x30] sm:$0xff]  ;;  %v448_v58 = vld [vmem:[#allocation4 + $0x38] sm:$0xff] }
 0x435   :  { %v449_v2 = vld [vmem:[#allocation5] sm:$0xff]  ;;  %v451_v10 = vld [vmem:[#allocation5 + $0x10] sm:$0xff]  ;;  %v450_v11 = vld [vmem:[#allocation5 + $0x8] sm:$0xff] }
 0x436   :  { %465 = vrot.lane.b32.xlu0 %v449_v2, %s1126_s24  ;;  %469 = vrot.lane.b32.xlu1 %v451_v10, %s1126_s24  ;;  %v452_v6 = vld [vmem:[#allocation5 + $0x18] sm:$0xff]  ;;  %v453_v16 = vld [vmem:[#allocation5 + $0x20] sm:$0xff]  ;;  %v454_v17 = vld [vmem:[#allocation5 + $0x28] sm:$0xff] }
 0x437   :  { %v455_v18 = vld [vmem:[#allocation5 + $0x30] sm:$0xff]  ;;  %v456_v19 = vld [vmem:[#allocation5 + $0x38] sm:$0xff]  ;;  %v912_v2 = vld [vmem:[%s1699_s10] ss:$0 sm:$0xff] }
 0x43a   :  { %467 = vrot.lane.b32.xlu0 %v450_v11, %s1126_s24  ;;  %471 = vrot.lane.b32.xlu1 %v452_v6, %s1126_s24 }
 0x43e   :  { %473 = vrot.lane.b32.xlu0 %v453_v16, %s1126_s24  ;;  %475 = vrot.lane.b32.xlu1 %v454_v17, %s1126_s24 }
 0x442   :  { %477 = vrot.lane.b32.xlu0 %v455_v18, %s1126_s24  ;;  %479 = vrot.lane.b32.xlu1 %v456_v19, %s1126_s24 }
 0x446   :  { %809 = vperm.xlu0 %1061, %v799_v20   ;;  %814 = vperm.xlu1 %1062, %v800_v21  }
 0x44a   :  { %819 = vperm.xlu1 %1062, %v801_v22  }
 0x44e   :  { %824 = vperm.xlu1 %1062, %v802_v23  }
 0x452   :  { %829 = vperm.xlu1 %1062, %v803_v24  }
 0x456   :  { %834 = vperm.xlu1 %1062, %v804_v25  }
 0x45a   :  { %839 = vperm.xlu1 %1062, %v805_v26  }
 0x45e   :  { %844 = vperm.xlu1 %1062, %v806_v27  }
 0x48e   :  { %v984_v3 = vpop.f32.mrb[0].mxu0 }
 0x48f   :  { %v1511_v4 = vadd.f32 %v984_v3, %v912_v2  ;;  %v566_v5 = vpop.f32.mrb[1].mxu0 }
 0x490   :  { %v1513_v11 = vadd.f32 %v912_v2, %v566_v5  ;;  %v985_v30 = vpop.f32.mrb[2].mxu0 }
 0x491   :  { %v1521_v6 = vadd.f32 %v985_v30, %v912_v2 }
 0x492   :  { %v988_v10 = vpop.f32.mrb[0].mxu1 }
 0x4a8   :  { %v466_v36 = vpop.permute.xlu0 %465  ;;  %v470_v38 = vpop.permute.xlu1 %469 }
 0x4a9   :  { %v1461_v37 = vsel %vm268_vm3, %v441_v28, %v466_v36  ;;  %v1466_v40 = vsel %vm268_vm3, %v443_v29, %v470_v38 }
 0x4aa   :  { %v598_v39 = vsel %vm597_vm4, %v1461_v37, 0.0  ;;  %v604_v44 = vsel %vm597_vm4, %v1466_v40, 0.0 }
 0x4ab   :  { %599 = vadd.xlane.f32.xlu0 %v598_v39 }
 0x4ac   :  { %v468_v43 = vpop.permute.xlu0 %467  ;;  %v472_v46 = vpop.permute.xlu1 %471 }
 0x4ad   :  { %v1471_v45 = vsel %vm268_vm3, %v442_v41, %v468_v43  ;;  %v1476_v48 = vsel %vm268_vm3, %v444_v42, %v472_v46 }
 0x4ae   :  { %v601_v47 = vsel %vm597_vm4, %v1471_v45, 0.0  ;;  %v607_v52 = vsel %vm597_vm4, %v1476_v48, 0.0 }
 0x4af   :  { %602 = vadd.xlane.f32.xlu1 %v601_v47  ;;  %605 = vadd.xlane.f32.xlu0 %v604_v44 }
 0x4b0   :  { %v474_v51 = vpop.permute.xlu0 %473  ;;  %v476_v54 = vpop.permute.xlu1 %475 }
 0x4b1   :  { %v1481_v53 = vsel %vm268_vm3, %v445_v49, %v474_v51  ;;  %v1486_v56 = vsel %vm268_vm3, %v446_v50, %v476_v54 }
 0x4b2   :  { %v610_v55 = vsel %vm597_vm4, %v1481_v53, 0.0  ;;  %v613_v60 = vsel %vm597_vm4, %v1486_v56, 0.0 }
 0x4b3   :  { %611 = vadd.xlane.f32.xlu1 %v610_v55  ;;  %608 = vadd.xlane.f32.xlu0 %v607_v52 }
 0x4b4   :  { %v478_v59 = vpop.permute.xlu0 %477  ;;  %v480_v62 = vpop.permute.xlu1 %479 }
 0x4b5   :  { %v1491_v61 = vsel %vm268_vm3, %v447_v57, %v478_v59  ;;  %v1496_v0 = vsel %vm268_vm3, %v448_v58, %v480_v62 }
 0x4b6   :  { %v616_v63 = vsel %vm597_vm4, %v1491_v61, 0.0  ;;  %v619_v1 = vsel %vm597_vm4, %v1496_v0, 0.0 }
 0x4b7   :  { %617 = vadd.xlane.f32.xlu1 %v616_v63  ;;  %614 = vadd.xlane.f32.xlu0 %v613_v60 }
 0x4bb   :  { %620 = vadd.xlane.f32.xlu0 %v619_v1 }
 0x4c5   :  { %v1519_v35 = vpop.permute.xlu1 %814  ;;  %v1547_v23 = vpop.permute.xlu0 %809 }
 0x4c8   :  { %769 = vrot.lane.b32.xlu1 %v1386_v31, %s1128_s2  ;;  %v582_v31 = vpop.f32.mrb[1].mxu1 }
 0x4c9   :  { %v1523_v14 = vadd.f32 %v912_v2, %v582_v31  ;;  %v1529_v16 = vpop.permute.xlu1 %819 }
 0x4cc   :  { %773 = vrot.lane.b32.xlu1 %v1396_v33, %s1128_s2  ;;  %v569_v33 = vpop.f32.mrb[3].mxu0 }
 0x4cd   :  { %v1533_v17 = vadd.f32 %v912_v2, %v569_v33  ;;  %v1536_v18 = vpop.permute.xlu1 %824 }
 0x4d0   :  { %727 = vrot.lane.b32.xlu1 %v1513_v11, %s1129_s8 }
 0x4d1   :  { %767 = vrot.lane.b32.xlu0 %v1380_v9, %s1128_s2  ;;  %v1516_v9 = vadd.f32 %v988_v10, %v912_v2  ;;  %v1541_v20 = vpop.permute.xlu1 %829 }
 0x4d4   :  { %733 = vrot.lane.b32.xlu1 %v1521_v6, %s1129_s8 }
 0x4d5   :  { %771 = vrot.lane.b32.xlu0 %v1391_v32, %s1128_s2  ;;  %v989_v32 = vpop.f32.mrb[2].mxu1  ;;  %v1543_v21 = vpop.permute.xlu1 %834 }
 0x4d6   :  { %v585_v34 = vpop.f32.mrb[3].mxu1  ;;  %v1527_v15 = vadd.f32 %v989_v32, %v912_v2 }
 0x4d7   :  { %v1538_v19 = vadd.f32 %v912_v2, %v585_v34 }
 0x4d8   :  { %741 = vrot.lane.b32.xlu1 %v1527_v15, %s1129_s8 }
 0x4d9   :  { %731 = vrot.lane.b32.xlu0 %v1511_v4, %s1129_s8  ;;  %v1545_v22 = vpop.permute.xlu1 %839 }
 0x4dc   :  { %729 = vrot.lane.b32.xlu1 %v1533_v17, %s1129_s8 }
 0x4dd   :  { %739 = vrot.lane.b32.xlu0 %v1516_v9, %s1129_s8  ;;  %v1549_v24 = vpop.permute.xlu1 %844 }
 0x4e0   :  { %737 = vrot.lane.b32.xlu1 %v1538_v19, %s1129_s8 }
 0x4e1   :  { %735 = vrot.lane.b32.xlu0 %v1523_v14, %s1129_s8 }
 0x538   :  { %v600_v25 = vpop.xlane.xlu0 %599 }
 0x539   :  { %v623_v26 = vmul.f32 0.03125, %v600_v25 }
 0x53b   :  { %v1552_v36 = vsub.f32 %v1461_v37, %v623_v26 }
 0x53c   :  { %v603_v27 = vpop.xlane.xlu1 %602  ;;  %v606_v28 = vpop.xlane.xlu0 %605 }
 0x53d   :  { %v624_v29 = vmul.f32 0.03125, %v603_v27  ;;  %v625_v38 = vmul.f32 0.03125, %v606_v28  ;;  %v639_v49 = vmul.f32 %v1552_v36, %v1552_v36 }
 0x53f   :  { %v1555_v39 = vsub.f32 %v1471_v45, %v624_v29  ;;  %v1560_v46 = vsub.f32 %v1466_v40, %v625_v38  ;;  %v647_v57 = vsel %vm597_vm4, %v639_v49, 0.0 }
 0x540   :  { %v612_v41 = vpop.xlane.xlu1 %611  ;;  %v609_v42 = vpop.xlane.xlu0 %608  ;;  %648 = vadd.xlane.f32.xlu1 %v647_v57 }
 0x541   :  { %v626_v43 = vmul.f32 0.03125, %v609_v42  ;;  %v640_v44 = vmul.f32 %v1555_v39, %v1555_v39  ;;  %v627_v47 = vmul.f32 0.03125, %v612_v41  ;;  %v641_v58 = vmul.f32 %v1560_v46, %v1560_v46 }
 0x543   :  { %v1565_v37 = vsub.f32 %v1476_v48, %v626_v43  ;;  %v650_v50 = vsel %vm597_vm4, %v640_v44, 0.0  ;;  %v1571_v55 = vsub.f32 %v1481_v53, %v627_v47  ;;  %v653_v1 = vsel %vm597_vm4, %v641_v58, 0.0 }
 0x544   :  { %v618_v45 = vpop.xlane.xlu1 %617  ;;  %651 = vadd.xlane.f32.xlu0 %v650_v50  ;;  %v615_v51 = vpop.xlane.xlu0 %614  ;;  %654 = vadd.xlane.f32.xlu1 %v653_v1 }
 0x545   :  { %v628_v52 = vmul.f32 0.03125, %v615_v51  ;;  %v642_v54 = vmul.f32 %v1565_v37, %v1565_v37  ;;  %v629_v40 = vmul.f32 0.03125, %v618_v45  ;;  %v643_v2 = vmul.f32 %v1571_v55, %v1571_v55 }
 0x547   :  { %v1577_v48 = vsub.f32 %v1486_v56, %v628_v52  ;;  %v656_v59 = vsel %vm597_vm4, %v642_v54, 0.0  ;;  %v1583_v53 = vsub.f32 %v1491_v61, %v629_v40  ;;  %v659_v10 = vsel %vm597_vm4, %v643_v2, 0.0 }
 0x548   :  { %657 = vadd.xlane.f32.xlu0 %v656_v59  ;;  %v621_v60 = vpop.xlane.xlu0 %620  ;;  %660 = vadd.xlane.f32.xlu1 %v659_v10 }
 0x549   :  { %v630_v62 = vmul.f32 0.03125, %v621_v60  ;;  %v644_v63 = vmul.f32 %v1577_v48, %v1577_v48  ;;  %v645_v61 = vmul.f32 %v1583_v53, %v1583_v53 }
 0x54b   :  { %v1589_v56 = vsub.f32 %v1496_v0, %v630_v62  ;;  %v662_v3 = vsel %vm597_vm4, %v644_v63, 0.0  ;;  %v665_v31 = vsel %vm597_vm4, %v645_v61, 0.0  ;;  %v770_v0 = vpop.permute.xlu1 %769 }
 0x54c   :  { %663 = vadd.xlane.f32.xlu0 %v662_v3  ;;  %666 = vadd.xlane.f32.xlu1 %v665_v31  ;;  %v1609_v32 = vpop.permute.xlu0 %767 }
 0x54d   :  { %v646_v5 = vmul.f32 %v1589_v56, %v1589_v56 }
 0x54f   :  { %v668_v30 = vsel %vm597_vm4, %v646_v5, 0.0  ;;  %v1607_v33 = vpop.permute.xlu1 %773  ;;  %v704_v5 = vadd.f32 1.0, %v1533_v17 }
 0x550   :  { %669 = vadd.xlane.f32.xlu0 %v668_v30  ;;  %v1611_v25 = vpop.permute.xlu0 %771 }
 0x553   :  { %v728_v34 = vpop.permute.xlu1 %727 }
 0x554   :  { %v1613_v27 = vpop.permute.xlu0 %731 }
 0x557   :  { %v734_v26 = vpop.permute.xlu1 %733 }
 0x55d   :  { %777 = vrot.lane.b32.xlu1 %v1410_v8, %s1128_s2  ;;  %v1615_v8 = vpop.permute.xlu1 %741 }
 0x561   :  { %781 = vrot.lane.b32.xlu1 %v1420_v13, %s1128_s2  ;;  %v730_v28 = vpop.permute.xlu1 %729 }
 0x565   :  { %v1621_v29 = vpop.permute.xlu1 %737 }
 0x566   :  { %775 = vrot.lane.b32.xlu0 %v1405_v7, %s1128_s2  ;;  %v1617_v7 = vpop.permute.xlu0 %739 }
 0x56a   :  { %779 = vrot.lane.b32.xlu0 %v1415_v12, %s1128_s2  ;;  %v1619_v13 = vpop.permute.xlu0 %735 }
 0x5cd   :  { %v649_v42 = vpop.xlane.xlu1 %648 }
 0x5ce   :  { %v671_v43 = vmul.f32 0.03125, %v649_v42 }
 0x5d0   :  { %v679_v49 = vadd.f32 1e-05, %v671_v43  ;;  %v706_v43 = vadd.f32 1.0, %v1521_v6 }
 0x5d1   :  { %v652_v12 = vpop.xlane.xlu0 %651  ;;  %v655_v45 = vpop.xlane.xlu1 %654 }
 0x5d2   :  { %v672_v38 = vmul.f32 0.03125, %v652_v12  ;;  %v673_v51 = vmul.f32 0.03125, %v655_v45 }
 0x5d4   :  { %v680_v41 = vadd.f32 1e-05, %v672_v38  ;;  %v681_v40 = vadd.f32 1e-05, %v673_v51  ;;  %v705_v51 = vadd.f32 1.0, %v1511_v4 }
 0x5d5   :  { %v658_v44 = vpop.xlane.xlu0 %657  ;;  %v661_v58 = vpop.xlane.xlu1 %660 }
 0x5d6   :  { %1063 = vrsqrt.f32 %v680_v41  ;;  %v674_v47 = vmul.f32 0.03125, %v658_v44  ;;  %v675_v59 = vmul.f32 0.03125, %v661_v58  ;;  %v703_v41 = vadd.f32 1.0, %v1513_v11 }
 0x5d7   :  { %1065 = vrsqrt.f32 %v679_v49 }
 0x5d8   :  { %v682_v50 = vadd.f32 1e-05, %v674_v47  ;;  %v683_v63 = vadd.f32 1e-05, %v675_v59 }
 0x5d9   :  { %v664_v52 = vpop.xlane.xlu0 %663  ;;  %v667_v3 = vpop.xlane.xlu1 %666 }
 0x5da   :  { %1067 = vrsqrt.f32 %v682_v50  ;;  %v676_v54 = vmul.f32 0.03125, %v664_v52  ;;  %v677_v61 = vmul.f32 0.03125, %v667_v3 }
 0x5db   :  { %1069 = vrsqrt.f32 %v681_v40 }
 0x5dc   :  { %v684_v57 = vadd.f32 1e-05, %v676_v54  ;;  %v685_v12 = vadd.f32 1e-05, %v677_v61 }
 0x5dd   :  { %v670_v60 = vpop.xlane.xlu0 %669  ;;  %v778_v4 = vpop.permute.xlu1 %777 }
 0x5de   :  { %1071 = vrsqrt.f32 %v684_v57  ;;  %v678_v62 = vmul.f32 0.03125, %v670_v60 }
 0x5df   :  { %1073 = vrsqrt.f32 %v683_v63 }
 0x5e0   :  { %v1064_v1 = vpop.eup %1063  ;;  %v686_v2 = vadd.f32 1e-05, %v678_v62 }
 0x5e1   :  { %v696_v10 = vmul.f32 %v1064_v1, %v1555_v39  ;;  %v1066_v30 = vpop.eup %1065  ;;  %v782_v63 = vpop.permute.xlu1 %781 }
 0x5e2   :  { %1075 = vrsqrt.f32 %v686_v2  ;;  %v695_v42 = vmul.f32 %v1066_v30, %v1552_v36  ;;  %v708_v36 = vadd.f32 1.0, %v1538_v19 }
 0x5e3   :  { %v712_v31 = vmul.f32 %v704_v5, %v696_v10  ;;  %1077 = vrsqrt.f32 %v685_v12 }
 0x5e4   :  { %v1068_v38 = vpop.eup %1067  ;;  %v711_v17 = vmul.f32 %v703_v41, %v695_v42 }
 0x5e5   :  { %v752_v44 = vadd.f32 %v730_v28, %v712_v31  ;;  %v698_v47 = vmul.f32 %v1068_v38, %v1565_v37  ;;  %v1070_v49 = vpop.eup %1069 }
 0x5e6   :  { %v751_v54 = vadd.f32 %v728_v34, %v711_v17  ;;  %v697_v11 = vmul.f32 %v1070_v49, %v1560_v46 }
 0x5e7   :  { %v792_v39 = vsel %vm597_vm4, %v752_v44, %v770_v0  ;;  %v714_v50 = vmul.f32 %v706_v43, %v698_v47 }
 0x5e8   :  { %v1072_v45 = vpop.eup %1071  ;;  %v848_v52 = vmul.f32 %v1519_v35, %v792_v39  ;;  %v791_v37 = vsel %vm597_vm4, %v751_v54, %v1609_v32  ;;  %v713_v0 = vmul.f32 %v705_v51, %v697_v11  ;;  %v710_v32 = vadd.f32 1.0, %v1527_v15 }
 0x5e9   :  { %v754_v6 = vadd.f32 %v734_v26, %v714_v50  ;;  %v700_v28 = vmul.f32 %v1072_v45, %v1577_v48  ;;  %v1074_v40 = vpop.eup %1073  ;;  %v847_v35 = vmul.f32 %v1547_v23, %v791_v37  ;;  %v707_v48 = vadd.f32 1.0, %v1523_v14 }
 0x5ea   :  { %856 = vst.msk [vmem:[%s1700_s11 + $0x8] sm:$0xff] %vm67_vm0, %v848_v52  ;;  %v753_v57 = vadd.f32 %v1613_v27, %v713_v0  ;;  %v699_v58 = vmul.f32 %v1074_v40, %v1571_v55 }
 0x5eb   :  { %v794_v46 = vsel %vm597_vm4, %v754_v6, %v1607_v33  ;;  %v716_v19 = vmul.f32 %v708_v36, %v700_v28  ;;  %855 = vst.msk [vmem:[%s1700_s11] sm:$0xff] %vm67_vm0, %v847_v35  ;;  %v776_v33 = vpop.permute.xlu0 %775 }
 0x5ec   :  { %v1076_v34 = vpop.eup %1075  ;;  %v850_v26 = vmul.f32 %v1536_v18, %v794_v46  ;;  %v793_v14 = vsel %vm597_vm4, %v753_v57, %v1611_v25  ;;  %v715_v18 = vmul.f32 %v707_v48, %v699_v58 }
 0x5ed   :  { %v756_v23 = vadd.f32 %v1621_v29, %v716_v19  ;;  %v702_v59 = vmul.f32 %v1076_v34, %v1589_v56  ;;  %v1078_v15 = vpop.eup %1077  ;;  %v849_v55 = vmul.f32 %v1529_v16, %v793_v14  ;;  %v709_v29 = vadd.f32 1.0, %v1516_v9 }
 0x5ee   :  { %858 = vst.msk [vmem:[%s1700_s11 + $0x18] sm:$0xff] %vm67_vm0, %v850_v26  ;;  %v755_v56 = vadd.f32 %v1619_v13, %v715_v18  ;;  %v701_v1 = vmul.f32 %v1078_v15, %v1583_v53 }
 0x5ef   :  { %v796_v27 = vsel %vm597_vm4, %v756_v23, %v778_v4  ;;  %v718_v60 = vmul.f32 %v710_v32, %v702_v59  ;;  %857 = vst.msk [vmem:[%s1700_s11 + $0x10] sm:$0xff] %vm67_vm0, %v849_v55  ;;  %v780_v53 = vpop.permute.xlu0 %779 }
 0x5f0   :  { %v852_v62 = vmul.f32 %v1543_v21, %v796_v27  ;;  %v795_v9 = vsel %vm597_vm4, %v755_v56, %v776_v33  ;;  %v717_v16 = vmul.f32 %v709_v29, %v701_v1 }
 0x5f1   :  { %v758_v25 = vadd.f32 %v1615_v8, %v718_v60  ;;  %v851_v21 = vmul.f32 %v1541_v20, %v795_v9 }
 0x5f2   :  { %860 = vst.msk [vmem:[%s1700_s11 + $0x28] sm:$0xff] %vm67_vm0, %v852_v62  ;;  %v757_v3 = vadd.f32 %v1617_v7, %v717_v16 }
 0x5f3   :  { %v798_v13 = vsel %vm597_vm4, %v758_v25, %v782_v63  ;;  %859 = vst.msk [vmem:[%s1700_s11 + $0x20] sm:$0xff] %vm67_vm0, %v851_v21 }
 0x5f4   :  { %v854_v2 = vmul.f32 %v1549_v24, %v798_v13  ;;  %v797_v8 = vsel %vm597_vm4, %v757_v3, %v780_v53 }
 0x5f5   :  { %v853_v20 = vmul.f32 %v1545_v22, %v797_v8 }
 0x5f6   :  { %862 = vst.msk [vmem:[%s1700_s11 + $0x38] sm:$0xff] %vm67_vm0, %v854_v2 }
 0x5f7   :  { %861 = vst.msk [vmem:[%s1700_s11 + $0x30] sm:$0xff] %vm67_vm0, %v853_v20 }

// kernel: duration_predictor_forward.5
= control target key start
LH: loop header
LB: loop body
LE: loop exit
PB: predicated region body
PF: predicated region fallthrough
CT: control target
= control target key end

     0   :  { %vm69_vm0 = vcmask 392192   ;;  %vm147_vm1 = vcmask 523264   ;;  %s1626_s1 = inlined_call_operand.vmem [shape: f32[64,1], index: 1, kind: input, shape index: {}]   ;;  %s1627_s2 = inlined_call_operand.vmem [shape: f32[2,8,12], index: 2, kind: input, shape index: {}]   ;;  %s1628_s3 = inlined_call_operand.vmem [shape: f32[48,64], index: 3, kind: input, shape index: {}]   ;;  %s1629_s9 = inlined_call_operand.vmem [shape: f32[32,64], index: 9, kind: input, shape index: {}]   ;;  %s1630_s10 = inlined_call_operand.vmem [shape: f32[1,64], index: 10, kind: input, shape index: {}]   ;;  %s1631_s11 = inlined_call_operand.vmem [shape: f32[64,64], index: 11, kind: output, shape index: {0}]   ;;  %s1632_s12 = inlined_call_operand.vmem [shape: f32[2,48,12], index: 12, kind: output, shape index: {1}]   ;;  %s1633_s6 = inlined_call_operand.vmem [shape: f32[48,64], index: 6, kind: input, shape index: {}]   ;;  %s1634_s0 = inlined_call_operand.vmem [shape: f32[64,48], index: 0, kind: input, shape index: {}]   ;;  %s1635_s4 = inlined_call_operand.vmem [shape: f32[16,64], index: 4, kind: input, shape index: {}]   ;;  %s1636_s7 = inlined_call_operand.vmem [shape: f32[16,64], index: 7, kind: input, shape index: {}]   ;;  %s1637_s5 = inlined_call_operand.vmem [shape: f32[1,64], index: 5, kind: input, shape index: {}]   ;;  %s1638_s8 = inlined_call_operand.vmem [shape: f32[1,64], index: 8, kind: input, shape index: {}]  }
   0x1   :  { %v53_v0 = vld [vmem:[%s1628_s3] sm:$0xff]  ;;  %v54_v1 = vld [vmem:[%s1628_s3 + $0x8] sm:$0xff]  ;;  %v55_v5 = vld [vmem:[%s1628_s3 + $0x10] sm:$0xff] }
   0x2   :  { %v156_v2 = vld [vmem:[%s1633_s6] sm:$0xff]  ;;  %v59_v3 = vpack.c.bf16 %v54_v1, %v53_v0  ;;  %v157_v4 = vld [vmem:[%s1633_s6 + $0x8] sm:$0xff]  ;;  %v56_v6 = vld [vmem:[%s1628_s3 + $0x18] sm:$0xff] }
   0x3   :  { %v162_v7 = vpack.c.bf16 %v157_v4, %v156_v2  ;;  %v60_v8 = vpack.c.bf16 %v56_v6, %v55_v5  ;;  %v158_v9 = vld [vmem:[%s1633_s6 + $0x10] sm:$0xff]  ;;  %v159_v10 = vld [vmem:[%s1633_s6 + $0x18] sm:$0xff]  ;;  %v57_v11 = vld [vmem:[%s1628_s3 + $0x20] sm:$0xff]  ;;  %v1423_v6 = vmov 0.0  }
   0x4   :  { %1035 = vmatprep.subr.bf16.mxu0 %v59_v3  ;;  %v163_v12 = vpack.c.bf16 %v159_v10, %v158_v9  ;;  %v58_v13 = vld [vmem:[%s1628_s3 + $0x28] sm:$0xff]  ;;  %v160_v14 = vld [vmem:[%s1633_s6 + $0x20] sm:$0xff]  ;;  %v43_v21 = vld [vmem:[%s1634_s0 + $0x10] sm:$0xff]  ;;  %v1429_v9 = vmov 0.0  }
   0x5   :  { %v161_v15 = vld [vmem:[%s1633_s6 + $0x28] sm:$0xff]  ;;  %1049 = vmatprep.subr.bf16.mxu1 %v162_v7  ;;  %1036 = vmatpush3.bf16.msra.mxu0 %v59_v3  ;;  %v41_v16 = vld [vmem:[%s1634_s0] sm:$0xff]  ;;  %v61_v18 = vpack.c.bf16 %v58_v13, %v57_v11  ;;  %v44_v22 = vld [vmem:[%s1634_s0 + $0x18] sm:$0xff] }
   0x6   :  { %v42_v17 = vld [vmem:[%s1634_s0 + $0x8] sm:$0xff]  ;;  %1050 = vmatpush3.bf16.msra.mxu1 %v162_v7  ;;  %1037 = vmatprep.subr.bf16.mxu0 %v60_v8  ;;  %v164_v20 = vpack.c.bf16 %v161_v15, %v160_v14  ;;  %v45_v23 = vld [vmem:[%s1634_s0 + $0x20] sm:$0xff]  ;;  %v50_v25 = vpack.c.bf16 %v44_v22, %v43_v21  ;;  %v47_v27 = vld [vmem:[%s1634_s0 + $0x30] sm:$0xff]  ;;  %v1425_v7 = vmov 0.0  }
   0x7   :  { %v49_v19 = vpack.c.bf16 %v42_v17, %v41_v16  ;;  %1051 = vmatprep.subr.bf16.mxu1 %v163_v12  ;;  %v46_v24 = vld [vmem:[%s1634_s0 + $0x28] sm:$0xff]  ;;  %v48_v28 = vld [vmem:[%s1634_s0 + $0x38] sm:$0xff]  ;;  %v1380_v30 = vld [vmem:[%s1635_s4] sm:$0xff] }
   0x8   :  { %v51_v26 = vpack.c.bf16 %v46_v24, %v45_v23  ;;  %v52_v29 = vpack.c.bf16 %v48_v28, %v47_v27  ;;  %v1385_v31 = vld [vmem:[%s1635_s4 + $0x8] sm:$0xff]  ;;  %v1390_v32 = vld [vmem:[%s1636_s7] sm:$0xff] }
   0x9   :  { %1041 = vmatprep.mubr.msk.bf16.mxu0 %vm69_vm0, %v49_v19  ;;  %1055 = vmatprep.mubr.msk.bf16.mxu1 %vm69_vm0, %v49_v19  ;;  %v247_v33 = vpack.c.bf16 %v1385_v31, %v1380_v30  ;;  %v1397_v34 = vld [vmem:[%s1636_s7 + $0x8] sm:$0xff]  ;;  %v955_v36 = vld [vmem:[%s1637_s5] ss:$0 sm:$0xff]  ;;  %s1431_s5 = smov 0  }
   0xa   :  { %1038 = vmatpush3.bf16.msra.mxu0 %v60_v8  ;;  %1052 = vmatpush3.bf16.msra.mxu1 %v163_v12  ;;  %v250_v35 = vpack.c.bf16 %v1397_v34, %v1390_v32  ;;  %v960_v37 = vld [vmem:[%s1638_s8] ss:$0 sm:$0xff]  ;;  %v1427_v8 = vmov 0.0  }
   0xb   :  { %1039 = vmatprep.subr.bf16.mxu0 %v61_v18  ;;  %1053 = vmatprep.subr.bf16.mxu1 %v164_v20 }
   0xe   :  { %1040 = vmatpush3.bf16.msra.mxu0 %v61_v18  ;;  %1054 = vmatpush3.bf16.msra.mxu1 %v164_v20 }
  0x11   :  { %1042 = vmatmul.mubr.msk.bf16.vlgmr.msra.gmra.mrb[0].mxu0 %vm69_vm0, %v50_v25  ;;  %1056 = vmatmul.mubr.msk.bf16.vlgmr.msra.gmra.mrb[0].mxu1 %vm69_vm0, %v50_v25 }
  0x12   :  { %1045 = vmatprep.mubr.msk.bf16.mxu0 %vm69_vm0, %v51_v26  ;;  %1059 = vmatprep.mubr.msk.bf16.mxu1 %vm69_vm0, %v51_v26 }
  0x19   :  { %1046 = vmatmul.mubr.msk.bf16.gmra.mrb[4].mxu0 %vm69_vm0, %v52_v29  ;;  %1060 = vmatmul.mubr.msk.bf16.gmra.mrb[4].mxu1 %vm69_vm0, %v52_v29 }
  0xe4   :  { %v1043_v38 = vpop.f32.mrb[0].mxu0  ;;  %v1057_v40 = vpop.f32.mrb[0].mxu1 }
  0xe5   :  { %v125_v39 = vadd.f32 %v1043_v38, %v955_v36  ;;  %v116_v41 = vpop.f32.mrb[1].mxu0  ;;  %v215_v42 = vadd.f32 %v1057_v40, %v960_v37  ;;  %v206_v44 = vpop.f32.mrb[1].mxu1 }
  0xe6   :  { %v117_v43 = vadd.f32 %v955_v36, %v116_v41  ;;  %v1044_v45 = vpop.f32.mrb[2].mxu0  ;;  %v207_v46 = vadd.f32 %v960_v37, %v206_v44  ;;  %v1058_v48 = vpop.f32.mrb[2].mxu1 }
  0xe7   :  { %150 = vst.msk [vmem:[#allocation2 + $0x10] sm:$0xff] %vm147_vm1, %v125_v39  ;;  %v128_v47 = vadd.f32 %v1044_v45, %v955_v36  ;;  %v119_v49 = vpop.f32.mrb[3].mxu0  ;;  %239 = vst.msk [vmem:[#allocation3 + $0x10] sm:$0xff] %vm147_vm1, %v215_v42  ;;  %v218_v50 = vadd.f32 %v1058_v48, %v960_v37  ;;  %v209_v52 = vpop.f32.mrb[3].mxu1 }
  0xe8   :  { %148 = vst.msk [vmem:[#allocation2] sm:$0xff] %vm147_vm1, %v117_v43  ;;  %v120_v51 = vadd.f32 %v955_v36, %v119_v49  ;;  %237 = vst.msk [vmem:[#allocation3] sm:$0xff] %vm147_vm1, %v207_v46  ;;  %v210_v53 = vadd.f32 %v960_v37, %v209_v52 }
  0xe9   :  { %151 = vst.msk [vmem:[#allocation2 + $0x18] sm:$0xff] %vm147_vm1, %v128_v47  ;;  %240 = vst.msk [vmem:[#allocation3 + $0x18] sm:$0xff] %vm147_vm1, %v218_v50 }
  0xea   :  { %149 = vst.msk [vmem:[#allocation2 + $0x8] sm:$0xff] %vm147_vm1, %v120_v51  ;;  %238 = vst.msk [vmem:[#allocation3 + $0x8] sm:$0xff] %vm147_vm1, %v210_v53 }
  0xec   :  { %v1047_v54 = vpop.f32.mrb[4].mxu0  ;;  %v1061_v56 = vpop.f32.mrb[4].mxu1 }
  0xed   :  { %v141_v55 = vadd.f32 %v1047_v54, %v955_v36  ;;  %v132_v57 = vpop.f32.mrb[5].mxu0  ;;  %v231_v58 = vadd.f32 %v1061_v56, %v960_v37  ;;  %v222_v60 = vpop.f32.mrb[5].mxu1 }
  0xee   :  { %v133_v59 = vadd.f32 %v955_v36, %v132_v57  ;;  %v1048_v61 = vpop.f32.mrb[6].mxu0  ;;  %v223_v62 = vadd.f32 %v960_v37, %v222_v60  ;;  %v1062_v0 = vpop.f32.mrb[6].mxu1 }
  0xef   :  { %154 = vst.msk [vmem:[#allocation2 + $0x30] sm:$0xff] %vm147_vm1, %v141_v55  ;;  %v144_v63 = vadd.f32 %v1048_v61, %v955_v36  ;;  %v135_v1 = vpop.f32.mrb[7].mxu0  ;;  %243 = vst.msk [vmem:[#allocation3 + $0x30] sm:$0xff] %vm147_vm1, %v231_v58  ;;  %v234_v2 = vadd.f32 %v1062_v0, %v960_v37  ;;  %v225_v4 = vpop.f32.mrb[7].mxu1 }
  0xf0   :  { %152 = vst.msk [vmem:[#allocation2 + $0x20] sm:$0xff] %vm147_vm1, %v133_v59  ;;  %v136_v3 = vadd.f32 %v955_v36, %v135_v1  ;;  %241 = vst.msk [vmem:[#allocation3 + $0x20] sm:$0xff] %vm147_vm1, %v223_v62  ;;  %v226_v5 = vadd.f32 %v960_v37, %v225_v4 }
  0xf1   :  { %155 = vst.msk [vmem:[#allocation2 + $0x38] sm:$0xff] %vm147_vm1, %v144_v63  ;;  %244 = vst.msk [vmem:[#allocation3 + $0x38] sm:$0xff] %vm147_vm1, %v234_v2 }
  0xf2   :  { %153 = vst.msk [vmem:[#allocation2 + $0x28] sm:$0xff] %vm147_vm1, %v136_v3  ;;  %242 = vst.msk [vmem:[#allocation3 + $0x28] sm:$0xff] %vm147_vm1, %v226_v5 }
  0xf3 LB: > { %v1236_v10 = vmov 0.0   ;;  %vm1237_vm2 = vmmov 0   ;;  %v266_v11 = vpack.c.bf16 %v1230_v9, %v1230_v9  ;;  %s1238_s7 = smov 80   ;;  %v356_v12 = vpack.c.bf16 %v1222_v7, %v1222_v7  ;;  %s1455_s8 = sshll.u32 %s1234_s5, 3  ;;  %s1234_s5 = sphi %s1431_s5, %s256_s5   ;;  %v1230_v9 = vphi %v1429_v9, %v346_v9   ;;  %v1226_v8 = vphi %v1427_v8, %v347_v8   ;;  %v1222_v7 = vphi %v1425_v7, %v435_v7   ;;  %v1218_v6 = vphi %v1423_v6, %v436_v6  }
  0xf4   : > { %1063 = vmatprep.subr.bf16.mxu0 %v1236_v10  ;;  %1065 = vmatprep.mubr.msk.bf16.mxu0 %vm1237_vm2, %v1236_v10  ;;  %vm270_vm3 = vcmask 130048   ;;  %s262_s14 = ssub.s32 7, %s1234_s5  ;;  %s264_s16 = scalar_lea.vmem [#allocation2], %s1455_s8  ;;  %v1239_v26 = vmov 0  }
  0xf5   : > { %1064 = vmatpush3.bf16.msra.mxu0 %v247_v33  ;;  %1069 = vmatprep.subr.bf16.mxu1 %v1236_v10  ;;  %s1458_s15 = sshll.u32 %s262_s14, 3  ;;  %s1240_s18 = smov 96  }
  0xf6   : > { %1070 = vmatpush3.bf16.msra.mxu1 %v250_v35  ;;  %1071 = vmatprep.mubr.msk.bf16.mxu1 %vm1237_vm2, %v1236_v10  ;;  %s354_s17 = scalar_lea.vmem [#allocation3], %s1458_s15  ;;  %s339_s21 = scalar_lea.vmem %s1626_s1, %s1455_s8 }
  0xf7   : > { %268 = vrot.lane.b32.xlu0 %v266_v11, %s1238_s7  ;;  %1159 = vset.pattern.permute.xlu1 %v1239_v26  ;;  %s1241_s22 = smov 16   ;;  %v340_v47 = vld [vmem:[%s339_s21] sm:$0xff]  ;;  %s428_s25 = scalar_lea.vmem %s1626_s1, %s1458_s15 }
  0xf8   : > { %1158 = vset.pattern.permute.xlu0 %v1239_v26  ;;  %v429_v49 = vld [vmem:[%s428_s25] sm:$0xff]  ;;  %s1242_s26 = smov 32   ;;  %s352_s27 = scalar_lea.vmem [#allocation4], %s1455_s8 }
  0xf9   : > { %v265_v15 = vld [vmem:[%s264_s16] sm:$0xff]  ;;  %s441_s28 = scalar_lea.vmem [#allocation5], %s1458_s15  ;;  %s256_s5 = sadd.s32 1, %s1234_s5  }
  0xfa   : > { %v355_v20 = vld [vmem:[%s354_s17] sm:$0xff]  ;;  %p253_p0 = scmp.ge.s32.totalorder %s256_s5, 8  }
  0xfb   : > { %358 = vrot.lane.b32.xlu0 %v356_v12, %s1238_s7  ;;  %s1243_s29 = smov (%p253_p0), 16   ;;  %v505_v30 = vld [vmem:[%s1629_s9 + $0x8] sm:$0xff] (%p253_p0)  ;;  %v506_v32 = vld [vmem:[%s1629_s9 + $0x10] sm:$0xff] (%p253_p0)  ;;  %v507_v33 = vld [vmem:[%s1629_s9 + $0x18] sm:$0xff] (%p253_p0)  ;;  %vm517_vm4 = vcmask (%p253_p0), 261120   ;;  %vm639_vm5 = vcmask (%p253_p0), 64512  }
  0xfc   :  { %v509_v34 = vpack.c.bf16 (%p253_p0), %v507_v33, %v506_v32  ;;  %v603_v35 = vld [vmem:[%s1634_s0] ss:$8 sm:$0xf] (%p253_p0)  ;;  %vm753_vm6 = vcmask (%p253_p0), 97280  }
 0x169   : > { %v269_v13 = vpop.permute.xlu0 %268 }
 0x16a   : > { %1066 = vmatmul.mubr.msk.bf16.vlgmr.msra.gmra.mrb[0].mxu0 %vm270_vm3, %v269_v13 }
 0x16d   : > { %v359_v14 = vpop.permute.xlu0 %358 }
 0x16e   : > { %1072 = vmatmul.mubr.msk.bf16.vlgmr.msra.gmra.mrb[0].mxu1 %vm270_vm3, %v359_v14 }
 0x23d   : > { %v308_v16 = vpop.f32.mrb[0].mxu0 }
 0x23e   : > { %v314_v17 = vadd.f32 %v308_v16, %v265_v15  ;;  %v1067_v18 = vpop.f32.mrb[1].mxu0 }
 0x23f   : > { %v311_v19 = vpop.f32.mrb[2].mxu0  ;;  %v982_v18 = vld [vmem:[%s1634_s0 + $0x1] ss:$8 sm:$0xf] (%p253_p0) }
 0x240   : > { %1160 = vtanh.f32 %v314_v17  ;;  %v1068_v21 = vpop.f32.mrb[3].mxu0  ;;  %v968_v36 = vmul.f32 -1.442695, %v314_v17  ;;  %v983_v19 = vld [vmem:[%s1634_s0 + $0x1] ss:$8 sm:$0xf0] (%p253_p0) }
 0x241   : > { %v397_v22 = vpop.f32.mrb[0].mxu1  ;;  %v984_v21 = vld [vmem:[%s1627_s2 + $0x8] sm:$0xff] (%p253_p0) }
 0x242   : > { %v403_v23 = vadd.f32 %v397_v22, %v355_v20  ;;  %v1073_v24 = vpop.f32.mrb[1].mxu1  ;;  %v763_v20 = vor.u32 (%p253_p0), %v983_v19, %v982_v18 }
 0x243   : > { %v400_v25 = vpop.f32.mrb[2].mxu1 }
 0x244   : > { %1162 = vtanh.f32 %v403_v23  ;;  %v1074_v27 = vpop.f32.mrb[3].mxu1  ;;  %v970_v37 = vmul.f32 -1.442695, %v403_v23 }
 0x245   : > { %1164 = vpow2.f32 %v968_v36 }
 0x246   : > { %1166 = vpow2.f32 %v970_v37 }
 0x24a   : > { %v1161_v28 = vpop.eup %1160 }
 0x24b   : > { %324 = vrot.lane.b32.xlu1 %v1161_v28, %s1240_s18 }
 0x24e   : > { %v1163_v29 = vpop.eup %1162 }
 0x24f   : > { %413 = vrot.lane.b32.xlu1 %v1163_v29, %s1240_s18  ;;  %v1165_v38 = vpop.eup %1164 }
 0x250   : > { %v318_v39 = vadd.f32 1.0, %v1165_v38  ;;  %v1167_v40 = vpop.eup %1166 }
 0x251   : > { %v407_v41 = vadd.f32 1.0, %v1167_v40 }
 0x252   : > { %1168 = vrcp.f32 %v318_v39 }
 0x253   : > { %1170 = vrcp.f32 %v407_v41 }
 0x25c   : > { %v1169_v42 = vpop.eup %1168 }
 0x25d   : > { %v1171_v45 = vpop.eup %1170  ;;  %v322_v50 = vmul.f32 %v1226_v8, %v1169_v42 }
 0x25e   : > { %v411_v53 = vmul.f32 %v1218_v6, %v1171_v45 }
 0x2bd   : > { %v325_v43 = vpop.permute.xlu1 %324 }
 0x2be   : > { %v327_v44 = vmul.f32 %v1169_v42, %v325_v43 }
 0x2c0   : > { %329 = vrot.lane.b32.xlu0 %v327_v44, %s1241_s22 }
 0x2c1   : > { %v414_v46 = vpop.permute.xlu1 %413 }
 0x2c2   : > { %v416_v48 = vmul.f32 %v1171_v45, %v414_v46 }
 0x2c4   : > { %343 = vperm.xlu0 %1158, %v340_v47   ;;  %418 = vrot.lane.b32.xlu1 %v416_v48, %s1241_s22 }
 0x2c8   : > { %432 = vperm.xlu1 %1159, %v429_v49  }
 0x332   : > { %v330_v51 = vpop.permute.xlu0 %329 }
 0x333   : > { %v332_v52 = vadd.f32 %v330_v51, %v322_v50 }
 0x335   : > { %1172 = vtanh.f32 %v332_v52 }
 0x336   : > { %v419_v54 = vpop.permute.xlu1 %418 }
 0x337   : > { %v421_v55 = vadd.f32 %v419_v54, %v411_v53 }
 0x339   : > { %1174 = vtanh.f32 %v421_v55 }
 0x33f   : > { %v1173_v56 = vpop.eup %1172 }
 0x340   : > { %335 = vrot.lane.b32.xlu1 %v1173_v56, %s1242_s26 }
 0x343   : > { %v1175_v57 = vpop.eup %1174  ;;  %v344_v58 = vpop.permute.xlu0 %343 }
 0x344   : > { %v347_v8 = vmul.f32 %v344_v58, %v332_v52   ;;  %424 = vrot.lane.b32.xlu0 %v1175_v57, %s1242_s26 }
 0x345   :  { %v638_v8 = vld [vmem:[%s1627_s2] sm:$0xff] (%p253_p0) }
 0x346   :  { %1087 = vmatprep.subr.mxu1 (%p253_p0), %v638_v8 }
 0x347   : > { %v433_v59 = vpop.permute.xlu1 %432  ;;  %1088 = vmatpush3.msra.mxu1 (%p253_p0), %v638_v8 }
 0x348   : > { %v436_v6 = vmul.f32 %v433_v59, %v421_v55   ;;  %1098 = vmatprep.subr.mxu1 (%p253_p0), %v984_v21 }
 0x349   :  { %v604_v6 = vld [vmem:[%s1634_s0] ss:$8 sm:$0xf0] (%p253_p0) }
 0x3b2   : > { %v336_v60 = vpop.permute.xlu1 %335 }
 0x3b3   : > { %v338_v61 = vmul.f32 %v1169_v42, %v336_v60 }
 0x3b5   : > { %v346_v9 = vmul.f32 %v344_v58, %v338_v61  }
 0x3b6   : > { %v425_v62 = vpop.permute.xlu0 %424 }
 0x3b7   : > { %v427_v63 = vmul.f32 %v1171_v45, %v425_v62  ;;  %349 = vrot.lane.b32.xlu1 %v346_v9, %s1238_s7  ;;  %v504_v9 = vld [vmem:[%s1629_s9] sm:$0xff] (%p253_p0) }
 0x3b8   :  { %v508_v31 = vpack.c.bf16 (%p253_p0), %v505_v30, %v504_v9 }
 0x3b9   : > { %v435_v7 = vmul.f32 %v433_v59, %v427_v63  }
 0x3ba   :  { %1075 = vmatprep.subr.bf16.mxu0 (%p253_p0), %v508_v31 }
 0x3bb   : > { %438 = vrot.lane.b32.xlu0 %v435_v7, %s1238_s7  ;;  %1076 = vmatpush3.bf16.msra.mxu0 (%p253_p0), %v508_v31  ;;  %v605_v7 = vor.u32 (%p253_p0), %v604_v6, %v603_v35 }
 0x3bc   :  { %1077 = vmatprep.subr.bf16.mxu0 (%p253_p0), %v509_v34 }
 0x3bf   :  { %1078 = vmatpush3.bf16.msra.mxu0 (%p253_p0), %v509_v34 }
 0x428   :  { %255 = sbr.rel (!%p253_p0) target bundleno = 243 (0xf3), region = 88 }
 0x429   : > { %v350_v0 = vpop.permute.xlu1 %349 }
 0x42a   : > { %353 = vst.msk [vmem:[%s352_s27] sm:$0xff] %vm270_vm3, %v350_v0 }
 0x42d   : > { %v439_v1 = vpop.permute.xlu0 %438 }
 0x42e   : > { %442 = vst.msk [vmem:[%s441_s28] sm:$0xff] %vm270_vm3, %v439_v1 }
 0x431   :  { %v443_v23 = vld [vmem:[#allocation4] sm:$0xff]  ;;  %v444_v24 = vld [vmem:[#allocation4 + $0x8] sm:$0xff]  ;;  %v445_v41 = vld [vmem:[#allocation4 + $0x10] sm:$0xff] }
 0x432   :  { %v447_v36 = vld [vmem:[#allocation4 + $0x20] sm:$0xff]  ;;  %v448_v37 = vld [vmem:[#allocation4 + $0x28] sm:$0xff]  ;;  %v446_v42 = vld [vmem:[#allocation4 + $0x18] sm:$0xff] }
 0x433   :  { %v449_v55 = vld [vmem:[#allocation4 + $0x30] sm:$0xff]  ;;  %v450_v56 = vld [vmem:[#allocation4 + $0x38] sm:$0xff] }
 0x435   :  { %v451_v2 = vld [vmem:[#allocation5] sm:$0xff]  ;;  %v452_v3 = vld [vmem:[#allocation5 + $0x8] sm:$0xff]  ;;  %v453_v11 = vld [vmem:[#allocation5 + $0x10] sm:$0xff] }
 0x436   :  { %v455_v4 = vld [vmem:[#allocation5 + $0x20] sm:$0xff]  ;;  %v1176_v5 = vpack.i.bf16 %v452_v3, %v451_v2  ;;  %v456_v10 = vld [vmem:[#allocation5 + $0x28] sm:$0xff]  ;;  %v454_v12 = vld [vmem:[#allocation5 + $0x18] sm:$0xff] }
 0x437   :  { %v1186_v13 = vpack.i.bf16 %v456_v10, %v455_v4  ;;  %v457_v14 = vld [vmem:[#allocation5 + $0x30] sm:$0xff]  ;;  %v458_v15 = vld [vmem:[#allocation5 + $0x38] sm:$0xff]  ;;  %v1181_v16 = vpack.i.bf16 %v454_v12, %v453_v11  ;;  %v971_v12 = vld [vmem:[%s1630_s10] ss:$0 sm:$0xff] }
 0x438   :  { %1177 = vrot.lane.b32.xlu0 %v1176_v5, %s1243_s29  ;;  %v1191_v17 = vpack.i.bf16 %v458_v15, %v457_v14 }
 0x439   :  { %1187 = vrot.lane.b32.xlu1 %v1186_v13, %s1243_s29 }
 0x43c   :  { %1182 = vrot.lane.b32.xlu0 %v1181_v16, %s1243_s29 }
 0x43d   :  { %1192 = vrot.lane.b32.xlu1 %v1191_v17, %s1243_s29 }
 0x45a   :  { %606 = vxpose.xlu0.b32.start.end [1/1] (short) (narrow) %v605_v7, 48 }
 0x466   :  { %764 = vxpose.xlu1.b32.start.end [1/1] (short) (narrow) %v763_v20, 48 }
 0x4aa   :  { %v1178_v22 = vpop.permute.xlu0 %1177 }
 0x4ab   :  { %v1180_v25 = vunpack.i.h.bf16 %v1178_v22  ;;  %v1179_v26 = vunpack.i.l.bf16 %v1178_v22  ;;  %v1188_v27 = vpop.permute.xlu1 %1187 }
 0x4ac   :  { %v1190_v28 = vunpack.i.h.bf16 %v1188_v27  ;;  %v1189_v29 = vunpack.i.l.bf16 %v1188_v27 }
 0x4ad   :  { %v492_v38 = vsel %vm270_vm3, %v443_v23, %v1179_v26  ;;  %v493_v39 = vsel %vm270_vm3, %v444_v24, %v1180_v25 }
 0x4ae   :  { %v1183_v40 = vpop.permute.xlu0 %1182  ;;  %v500_v43 = vpack.c.bf16 %v493_v39, %v492_v38  ;;  %v496_v46 = vsel %vm270_vm3, %v447_v36, %v1189_v29  ;;  %v497_v47 = vsel %vm270_vm3, %v448_v37, %v1190_v28 }
 0x4af   :  { %v1185_v44 = vunpack.i.h.bf16 %v1183_v40  ;;  %v1184_v45 = vunpack.i.l.bf16 %v1183_v40  ;;  %v1193_v48 = vpop.permute.xlu1 %1192  ;;  %v502_v52 = vpack.c.bf16 %v497_v47, %v496_v46 }
 0x4b0   :  { %1079 = vmatprep.mubr.msk.bf16.mxu0 %vm517_vm4, %v500_v43  ;;  %v1195_v53 = vunpack.i.h.bf16 %v1193_v48  ;;  %v1194_v54 = vunpack.i.l.bf16 %v1193_v48 }
 0x4b1   :  { %v494_v49 = vsel %vm270_vm3, %v445_v41, %v1184_v45  ;;  %v495_v50 = vsel %vm270_vm3, %v446_v42, %v1185_v44 }
 0x4b2   :  { %v501_v51 = vpack.c.bf16 %v495_v50, %v494_v49  ;;  %v498_v57 = vsel %vm270_vm3, %v449_v55, %v1194_v54  ;;  %v499_v58 = vsel %vm270_vm3, %v450_v56, %v1195_v53 }
 0x4b3   :  { %v503_v59 = vpack.c.bf16 %v499_v58, %v498_v57 }
 0x4b4   :  { %1080 = vmatmul.mubr.msk.bf16.vlgmr.msra.gmra.mrb[0].mxu0 %vm517_vm4, %v501_v51 }
 0x4b5   :  { %1083 = vmatprep.mubr.msk.bf16.mxu0 %vm517_vm4, %v502_v52 }
 0x4bc   :  { %1084 = vmatmul.mubr.msk.bf16.gmra.mrb[4].mxu0 %vm517_vm4, %v503_v59 }
 0x4da   :  { %v622_v60 = vpop.trf.xlu0 }
 0x4db   :  { %1089 = vmatprep.mubr.msk.f32.mxu1 %vm639_vm5, %v622_v60 }
 0x4de   :  { %v623_v61 = vpop.trf.xlu0 }
 0x4df   :  { %1090 = vmatmul.mubr.msk.f32.vlgmr.msra.gmra.mrb[0].mxu1 %vm639_vm5, %v623_v61 }
 0x4e0   :  { %1099 = vmatpush3.msra.mxu1 %v984_v21 }
 0x4e2   :  { %v624_v62 = vpop.trf.xlu0 }
 0x4e3   :  { %1092 = vmatprep.mubr.msk.f32.mxu1 %vm639_vm5, %v624_v62 }
 0x4e6   :  { %v780_v63 = vpop.trf.xlu1  ;;  %v625_v0 = vpop.trf.xlu0 }
 0x4e7   :  { %1093 = vmatmul.mubr.msk.f32.gmra.mrb[2].mxu1 %vm639_vm5, %v625_v0 }
 0x4ea   :  { %v781_v1 = vpop.trf.xlu1  ;;  %v626_v2 = vpop.trf.xlu0 }
 0x4eb   :  { %1095 = vmatprep.mubr.msk.f32.mxu1 %vm639_vm5, %v626_v2 }
 0x4ee   :  { %v782_v3 = vpop.trf.xlu1  ;;  %v627_v4 = vpop.trf.xlu0 }
 0x4ef   :  { %1096 = vmatmul.mubr.msk.f32.gmra.mrb[4].mxu1 %vm639_vm5, %v627_v4 }
 0x4f0   :  { %1100 = vmatprep.mubr.msk.f32.mxu1 %vm639_vm5, %v780_v63 }
 0x4f2   :  { %v783_v5 = vpop.trf.xlu1 }
 0x4f3   :  { %1101 = vmatmul.mubr.msk.f32.vlgmr.msra.gmra.mrb[6].mxu1 %vm639_vm5, %v781_v1 }
 0x4f4   :  { %1103 = vmatprep.mubr.msk.f32.mxu1 %vm639_vm5, %v782_v3 }
 0x4f6   :  { %v784_v10 = vpop.trf.xlu1 }
 0x4f7   :  { %1104 = vmatmul.mubr.msk.f32.gmra.mrb[8].mxu1 %vm639_vm5, %v783_v5 }
 0x4f8   :  { %1106 = vmatprep.mubr.msk.f32.mxu1 %vm639_vm5, %v784_v10 }
 0x4fa   :  { %v785_v11 = vpop.trf.xlu1 }
 0x4fb   :  { %1107 = vmatmul.mubr.msk.f32.gmra.mrb[10].mxu1 %vm639_vm5, %v785_v11 }
 0x587   :  { %v1081_v13 = vpop.f32.mrb[0].mxu0 }
 0x588   :  { %v573_v14 = vadd.f32 %v1081_v13, %v971_v12  ;;  %v564_v15 = vpop.f32.mrb[1].mxu0 }
 0x589   :  { %v565_v16 = vadd.f32 %v971_v12, %v564_v15  ;;  %v1082_v17 = vpop.f32.mrb[2].mxu0 }
 0x58a   :  { %597 = vst.msk [vmem:[%s1631_s11 + $0x10] sm:$0xff] %vm147_vm1, %v573_v14  ;;  %v576_v9 = vadd.f32 %v1082_v17, %v971_v12  ;;  %v567_v30 = vpop.f32.mrb[3].mxu0 }
 0x58b   :  { %595 = vst.msk [vmem:[%s1631_s11] sm:$0xff] %vm147_vm1, %v565_v16  ;;  %v568_v31 = vadd.f32 %v971_v12, %v567_v30 }
 0x58c   :  { %598 = vst.msk [vmem:[%s1631_s11 + $0x18] sm:$0xff] %vm147_vm1, %v576_v9 }
 0x58d   :  { %596 = vst.msk [vmem:[%s1631_s11 + $0x8] sm:$0xff] %vm147_vm1, %v568_v31 }
 0x58f   :  { %v1085_v32 = vpop.f32.mrb[4].mxu0 }
 0x590   :  { %v589_v33 = vadd.f32 %v1085_v32, %v971_v12  ;;  %v580_v34 = vpop.f32.mrb[5].mxu0 }
 0x591   :  { %v581_v35 = vadd.f32 %v971_v12, %v580_v34  ;;  %v1086_v6 = vpop.f32.mrb[6].mxu0 }
 0x592   :  { %601 = vst.msk [vmem:[%s1631_s11 + $0x30] sm:$0xff] %vm147_vm1, %v589_v33  ;;  %v592_v7 = vadd.f32 %v1086_v6, %v971_v12  ;;  %v583_v8 = vpop.f32.mrb[7].mxu0 }
 0x593   :  { %599 = vst.msk [vmem:[%s1631_s11 + $0x20] sm:$0xff] %vm147_vm1, %v581_v35  ;;  %v584_v18 = vadd.f32 %v971_v12, %v583_v8 }
 0x594   :  { %602 = vst.msk [vmem:[%s1631_s11 + $0x38] sm:$0xff] %vm147_vm1, %v592_v7 }
 0x595   :  { %600 = vst.msk [vmem:[%s1631_s11 + $0x28] sm:$0xff] %vm147_vm1, %v584_v18 }
 0x5b2   :  { %v1091_v19 = vpop.f32.mrb[0].mxu1 }
 0x5b3   :  { %755 = vst.msk [vmem:[%s1632_s12 + $0x8] sm:$0xff] %vm753_vm6, %v1091_v19  ;;  %v724_v20 = vpop.f32.mrb[1].mxu1 }
 0x5b4   :  { %754 = vst.msk [vmem:[%s1632_s12] sm:$0xff] %vm753_vm6, %v724_v20 }
 0x5ba   :  { %v1094_v21 = vpop.f32.mrb[2].mxu1 }
 0x5bb   :  { %757 = vst.msk [vmem:[%s1632_s12 + $0x18] sm:$0xff] %vm753_vm6, %v1094_v21  ;;  %v734_v22 = vpop.f32.mrb[3].mxu1 }
 0x5bc   :  { %756 = vst.msk [vmem:[%s1632_s12 + $0x10] sm:$0xff] %vm753_vm6, %v734_v22 }
 0x5c2   :  { %v1097_v23 = vpop.f32.mrb[4].mxu1 }
 0x5c3   :  { %759 = vst.msk [vmem:[%s1632_s12 + $0x28] sm:$0xff] %vm753_vm6, %v1097_v23  ;;  %v744_v24 = vpop.f32.mrb[5].mxu1 }
 0x5c4   :  { %758 = vst.msk [vmem:[%s1632_s12 + $0x20] sm:$0xff] %vm753_vm6, %v744_v24 }
 0x5c6   :  { %v1102_v25 = vpop.f32.mrb[6].mxu1 }
 0x5c7   :  { %992 = vst.msk [vmem:[%s1632_s12 + $0x38] sm:$0xff] %vm753_vm6, %v1102_v25  ;;  %v882_v26 = vpop.f32.mrb[7].mxu1 }
 0x5c8   :  { %991 = vst.msk [vmem:[%s1632_s12 + $0x30] sm:$0xff] %vm753_vm6, %v882_v26 }
 0x5ca   :  { %v1105_v27 = vpop.f32.mrb[8].mxu1 }
 0x5cb   :  { %994 = vst.msk [vmem:[%s1632_s12 + $0x48] sm:$0xff] %vm753_vm6, %v1105_v27  ;;  %v892_v28 = vpop.f32.mrb[9].mxu1 }
 0x5cc   :  { %993 = vst.msk [vmem:[%s1632_s12 + $0x40] sm:$0xff] %vm753_vm6, %v892_v28 }
 0x5ce   :  { %v1108_v29 = vpop.f32.mrb[10].mxu1 }
 0x5cf   :  { %996 = vst.msk [vmem:[%s1632_s12 + $0x58] sm:$0xff] %vm753_vm6, %v1108_v29  ;;  %v902_v36 = vpop.f32.mrb[11].mxu1 }
 0x5d0   :  { %995 = vst.msk [vmem:[%s1632_s12 + $0x50] sm:$0xff] %vm753_vm6, %v902_v36 }

</bundles_post_ra>
